<compile_context>
chip_gen: v6e
topology: v6e:2x2x1
jax: 0.10.0
libtpu: 0.0.40
codegen_flags: <defaults>
</compile_context>

<pallas_src>
import functools

import jax
import jax.numpy as jnp
from jax import lax
from jax.experimental import pallas as pl
from jax.experimental.pallas import tpu as pltpu

HIDDEN = 27            # LSTM hidden size from the PyTorch module
GATE_W = 128           # all 4 gates packed into one 128-lane block
HL = GATE_W // 4       # per-gate lane stride (32) == padded hidden width


def _round_up(v, m):
    return ((v + m - 1) // m) * m


# -----------------------------------------------------------------------------
# Kernel: full time chunk (LSTM recurrence) + hoisted MLP head.
# grid = (batch_tiles, time_chunks); time is the inner "arbitrary" axis.
# -----------------------------------------------------------------------------
def lstm_head_kernel(x_ref, h0_ref, c0_ref,
                     wx_ref, wh_ref, bg_ref,
                     w1_ref, b1_ref, w2_ref, b2_ref, w3_ref, b3_ref,
                     lstm_out_ref, hn_ref, cn_ref, out_ref,
                     h_sc, c_sc, *, tt, t_total, mask_tail):
    tc = pl.program_id(1)
    nt = pl.num_programs(1)

    # New batch tile -> load caller-provided initial state into the carry scratch.
    @pl.when(tc == 0)
    def _():
        h_sc[...] = h0_ref[...]
        c_sc[...] = c0_ref[...]

    def step(t, carry):
        del carry
        h_prev = h_sc[...]                       # (tb, HL)
        c_prev = c_sc[...]                       # (tb, HL)
        x_t = x_ref[t]                           # (tb, CP)

        # Packed gate pre-activations: lanes [32g, 32g+27) hold gate g (i,f,g,o).
        gates = (jnp.dot(x_t, wx_ref[...], preferred_element_type=jnp.float32)
                 + jnp.dot(h_prev, wh_ref[...], preferred_element_type=jnp.float32)
                 + bg_ref[...])                  # (tb, 128)

        i_g = jax.nn.sigmoid(gates[:, 0 * HL:1 * HL])
        f_g = jax.nn.sigmoid(gates[:, 1 * HL:2 * HL])
        g_g = jnp.tanh(gates[:, 2 * HL:3 * HL])
        o_g = jax.nn.sigmoid(gates[:, 3 * HL:4 * HL])

        c_new = f_g * c_prev + i_g * g_g
        h_new = o_g * jnp.tanh(c_new)

        if mask_tail:                            # static python bool
            valid = (tc * tt + t) < t_total
            h_new = jnp.where(valid, h_new, h_prev)
            c_new = jnp.where(valid, c_new, c_prev)

        h_sc[...] = h_new
        c_sc[...] = c_new
        lstm_out_ref[t] = h_new
        return 0

    lax.fori_loop(0, tt, step, 0, unroll=True if tt <= 16 else False)

    # Final state written exactly once (resident output blocks over the time axis).
    @pl.when(tc == nt - 1)
    def _():
        hn_ref[...] = h_sc[...]
        cn_ref[...] = c_sc[...]

    # Hoisted MLP head: one pass over the whole (tt*tb)-row lstm_out slab in VMEM.
    tb = lstm_out_ref.shape[1]
    z = lstm_out_ref[...].reshape(tt * tb, HL)
    a = jnp.maximum(
        jnp.dot(z, w1_ref[...], preferred_element_type=jnp.float32) + b1_ref[...], 0.0)
    a = jnp.maximum(
        jnp.dot(a, w2_ref[...], preferred_element_type=jnp.float32) + b2_ref[...], 0.0)
    o = jnp.dot(a, w3_ref[...], preferred_element_type=jnp.float32) + b3_ref[...]
    out_ref[...] = o.reshape(tt, tb, o.shape[-1])


# -----------------------------------------------------------------------------
# Wrapper
# -----------------------------------------------------------------------------
def pollutant_pred_lstm(x, h0, c0, pp, *, hidden=HIDDEN, out_channel=6,
                        tb=None, tt=None):
    """x: (B, T, C) f32, h0/c0: (1, B, hidden) -> (lstm_out, hn, cn, output)."""
    B, T, C = x.shape
    CP = pp["wx"].shape[0]
    OUTP = pp["w3"].shape[1]
    f32 = jnp.float32

    if tb is None:
        tb = min(128, _round_up(B, 8))           # <=128 so large B spreads over cores
    assert tb % 8 == 0
    Bp = _round_up(B, tb)
    nb = Bp // tb

    if tt is None:
        # Cap the time-chunk so x / lstm_out / head-output slabs stay well under VMEM.
        tt = min(T, max(8, 4096 // tb))
    Tp = _round_up(T, tt)
    nt = Tp // tt
    mask_tail = (Tp != T)

    # Zero-padded, time-major layout: every BlockSpec tile is (8,128)-friendly, and
    # zero padding keeps padded hidden lanes / batch rows exactly zero through the
    # recurrence (do NOT pad weights/biases with nonzero values).
    xp = jnp.zeros((Tp, Bp, CP), f32).at[:T, :B, :C].set(
        jnp.transpose(x.astype(f32), (1, 0, 2)))
    h0p = jnp.zeros((Bp, HL), f32).at[:B, :hidden].set(h0[0].astype(f32))
    c0p = jnp.zeros((Bp, HL), f32).at[:B, :hidden].set(c0[0].astype(f32))

    def full(a):
        return pl.BlockSpec(a.shape, lambda i, t: (0, 0))

    in_specs = [
        pl.BlockSpec((tt, tb, CP), lambda i, t: (t, i, 0)),     # x time slab
        pl.BlockSpec((tb, HL), lambda i, t: (i, 0)),            # h0
        pl.BlockSpec((tb, HL), lambda i, t: (i, 0)),            # c0
        full(pp["wx"]), full(pp["wh"]), full(pp["bg"]),
        full(pp["w1"]), full(pp["b1"]),
        full(pp["w2"]), full(pp["b2"]),
        full(pp["w3"]), full(pp["b3"]),
    ]
    out_specs = [
        pl.BlockSpec((tt, tb, HL), lambda i, t: (t, i, 0)),     # lstm_out slab
        pl.BlockSpec((tb, HL), lambda i, t: (i, 0)),            # hn (resident over t)
        pl.BlockSpec((tb, HL), lambda i, t: (i, 0)),            # cn (resident over t)
        pl.BlockSpec((tt, tb, OUTP), lambda i, t: (t, i, 0)),   # head output slab
    ]
    out_shape = (
        jax.ShapeDtypeStruct((Tp, Bp, HL), f32),
        jax.ShapeDtypeStruct((Bp, HL), f32),
        jax.ShapeDtypeStruct((Bp, HL), f32),
        jax.ShapeDtypeStruct((Tp, Bp, OUTP), f32),
    )

    lstm_out_p, hn_p, cn_p, out_p = pl.pallas_call(
        functools.partial(lstm_head_kernel, tt=tt, t_total=T, mask_tail=mask_tail),
        out_shape=out_shape,
        grid_spec=pltpu.PrefetchScalarGridSpec(
            num_scalar_prefetch=0,
            grid=(nb, nt),
            in_specs=in_specs,
            out_specs=out_specs,
            scratch_shapes=[pltpu.VMEM((tb, HL), f32),
                            pltpu.VMEM((tb, HL), f32)],
        ),
        compiler_params=pltpu.CompilerParams(
            dimension_semantics=("parallel", "arbitrary")),
    )(xp, h0p, c0p,
      pp["wx"], pp["wh"], pp["bg"],
      pp["w1"], pp["b1"], pp["w2"], pp["b2"], pp["w3"], pp["b3"])

    lstm_out = jnp.transpose(lstm_out_p[:T], (1, 0, 2))[:B, :, :hidden]   # (B, T, 27)
    hn = hn_p[:B, :hidden][None]                                          # (1, B, 27)
    cn = cn_p[:B, :hidden][None]                                          # (1, B, 27)
    output = (jnp.transpose(out_p[:T], (1, 0, 2))[:B]
              .reshape(B * T, OUTP)[:, :out_channel])                     # (B*T, out)
    return lstm_out, hn, cn, output


# -----------------------------------------------------------------------------
# Parameters (synthetic, PyTorch layout) + packed/folded Pallas layout
# -----------------------------------------------------------------------------
def init_raw_params(key, input_channel, output_channel, hidden=HIDDEN):
    H = hidden
    eps = 1e-5
    keys = list(jax.random.split(key, 16))
    k = iter(keys)
    u = lambda kk, shape, b: jax.random.uniform(kk, shape, jnp.float32, -b, b)
    p = {}
    b_lstm = 1.0 / float(jnp.sqrt(H))
    p["w_ih"] = u(next(k), (4 * H, input_channel), b_lstm)
    p["w_hh"] = u(next(k), (4 * H, H), b_lstm)
    p["b_ih"] = u(next(k), (4 * H,), b_lstm)
    p["b_hh"] = u(next(k), (4 * H,), b_lstm)
    # Head layer 1: Linear(27->128, no bias) + BN(128)
    p["w1"] = u(next(k), (128, H), 1.0 / float(jnp.sqrt(H)))
    g1 = 1.0 + 0.1 * jax.random.normal(next(k), (128,), jnp.float32)
    be1 = 0.1 * jax.random.normal(next(k), (128,), jnp.float32)
    m1 = 0.05 * jax.random.normal(next(k), (128,), jnp.float32)
    v1 = jnp.abs(1.0 + 0.1 * jax.random.normal(next(k), (128,), jnp.float32))
    p["scale1"] = g1 / jnp.sqrt(v1 + eps)
    p["shift1"] = be1 - m1 * p["scale1"]
    # Head layer 2: Linear(128->64, no bias) + BN(64)
    p["w2"] = u(next(k), (64, 128), 1.0 / float(jnp.sqrt(128.0)))
    g2 = 1.0 + 0.1 * jax.random.normal(next(k), (64,), jnp.float32)
    be2 = 0.1 * jax.random.normal(next(k), (64,), jnp.float32)
    m2 = 0.05 * jax.random.normal(next(k), (64,), jnp.float32)
    v2 = jnp.abs(1.0 + 0.1 * jax.random.normal(next(k), (64,), jnp.float32))
    p["scale2"] = g2 / jnp.sqrt(v2 + eps)
    p["shift2"] = be2 - m2 * p["scale2"]
    # Head layer 3: Linear(64 -> out_channel) with bias
    p["w3"] = u(next(k), (output_channel, 64), 1.0 / float(jnp.sqrt(64.0)))
    p["b3"] = u(next(k), (output_channel,), 1.0 / float(jnp.sqrt(64.0)))
    return p


def prepare_params(raw, input_channel, output_channel, hidden=HIDDEN):
    """Pack gates into 128 lanes, pad features, fold BatchNorm (eval) into weights."""
    H = hidden
    assert H <= HL, "hidden must fit the 32-lane per-gate packing"
    CP = _round_up(input_channel, 128)
    OUTP = _round_up(output_channel, 128)
    f32 = jnp.float32

    wx = jnp.zeros((CP, GATE_W), f32)
    wh = jnp.zeros((HL, GATE_W), f32)
    bg = jnp.zeros((1, GATE_W), f32)
    for g in range(4):                           # PyTorch gate order [i, f, g, o]
        col = g * HL
        wx = wx.at[:input_channel, col:col + H].set(raw["w_ih"][g * H:(g + 1) * H, :].T)
        wh = wh.at[:H, col:col + H].set(raw["w_hh"][g * H:(g + 1) * H, :].T)
        bg = bg.at[0, col:col + H].set(raw["b_ih"][g * H:(g + 1) * H]
                                       + raw["b_hh"][g * H:(g + 1) * H])

    # Layer 1: (27 -> 128), BN scale folded into weight columns.
    w1 = jnp.zeros((HL, 128), f32).at[:H, :].set(raw["w1"].T * raw["scale1"][None, :])
    b1 = raw["shift1"][None, :].astype(f32)                       # (1, 128)
    # Layer 2: (128 -> 64) padded to 128 output lanes.
    w2 = jnp.zeros((128, 128), f32).at[:, :64].set(raw["w2"].T * raw["scale2"][None, :])
    b2 = jnp.zeros((1, 128), f32).at[0, :64].set(raw["shift2"])
    # Layer 3: (64 -> out) padded to (128, OUTP).
    w3 = jnp.zeros((128, OUTP), f32).at[:64, :output_channel].set(raw["w3"].T)
    b3 = jnp.zeros((1, OUTP), f32).at[0, :output_channel].set(raw["b3"])

    return {"wx": wx, "wh": wh, "bg": bg,
            "w1": w1, "b1": b1, "w2": w2, "b2": b2, "w3": w3, "b3": b3}


# -----------------------------------------------------------------------------
# Pure-JAX reference (unpadded, PyTorch semantics, eval mode)
# -----------------------------------------------------------------------------
def reference_forward(x, h0, c0, raw, hidden=HIDDEN):
    H = hidden
    Wih, Whh = raw["w_ih"], raw["w_hh"]
    b = raw["b_ih"] + raw["b_hh"]

    def step(carry, x_t):
        h, c = carry
        gates = x_t @ Wih.T + h @ Whh.T + b
        i = jax.nn.sigmoid(gates[:, 0 * H:1 * H])
        f = jax.nn.sigmoid(gates[:, 1 * H:2 * H])
        g = jnp.tanh(gates[:, 2 * H:3 * H])
        o = jax.nn.sigmoid(gates[:, 3 * H:4 * H])
        c = f * c + i * g
        h = o * jnp.tanh(c)
        return (h, c), h

    (hn, cn), ys = jax.lax.scan(step, (h0[0], c0[0]), jnp.transpose(x, (1, 0, 2)))
    lstm_out = jnp.transpose(ys, (1, 0, 2))                      # (B, T, H)
    z = lstm_out.reshape(-1, H)
    a = jnp.maximum(z @ raw["w1"].T * raw["scale1"] + raw["shift1"], 0.0)
    a = jnp.maximum(a @ raw["w2"].T * raw["scale2"] + raw["shift2"], 0.0)
    out = a @ raw["w3"].T + raw["b3"]
    return lstm_out, hn[None], cn[None], out


if __name__ == "__main__":
    key = jax.random.PRNGKey(0)
    k_param, k_x, k_h, k_c = jax.random.split(key, 4)

    input_channel, output_channel = 22, 6
    B, T = 2, 8

    raw = init_raw_params(k_param, input_channel, output_channel)
    pp = prepare_params(raw, input_channel, output_channel)

    x = jax.random.normal(k_x, (B, T, input_channel), jnp.float32)
    h0 = 0.1 * jax.random.normal(k_h, (1, B, HIDDEN), jnp.float32)
    c0 = 0.1 * jax.random.normal(k_c, (1, B, HIDDEN), jnp.float32)

    lstm_out, hn, cn, out = pollutant_pred_lstm(
        x, h0, c0, pp, out_channel=output_channel)
    jax.block_until_ready((lstm_out, hn, cn, out))

    r_lstm, r_hn, r_cn, r_out = reference_forward(x, h0, c0, raw)

    assert lstm_out.shape == (B, T, HIDDEN)
    assert hn.shape == (1, B, HIDDEN) and cn.shape == (1, B, HIDDEN)
    assert out.shape == (B * T, output_channel)
    assert jnp.allclose(lstm_out, r_lstm, atol=2e-3, rtol=2e-3), "lstm_out mismatch"
    assert jnp.allclose(hn, r_hn, atol=2e-3, rtol=2e-3), "hn mismatch"
    assert jnp.allclose(cn, r_cn, atol=2e-3, rtol=2e-3), "cn mismatch"
    assert jnp.allclose(out, r_out, atol=2e-3, rtol=2e-3), "head output mismatch"
    print("KERNEL_OK")
</pallas_src>

<mosaic_0001>
module attributes {stable_mosaic.version = 11 : i64} {
  func.func @lstm_head_kernel(%arg0: i32, %arg1: i32, %arg2: memref<8x8x128xf32, #tpu.memory_space<vmem>>, %arg3: memref<8x32xf32, #tpu.memory_space<vmem>>, %arg4: memref<8x32xf32, #tpu.memory_space<vmem>>, %arg5: memref<128x128xf32, #tpu.memory_space<vmem>>, %arg6: memref<32x128xf32, #tpu.memory_space<vmem>>, %arg7: memref<1x128xf32, #tpu.memory_space<vmem>>, %arg8: memref<32x128xf32, #tpu.memory_space<vmem>>, %arg9: memref<1x128xf32, #tpu.memory_space<vmem>>, %arg10: memref<128x128xf32, #tpu.memory_space<vmem>>, %arg11: memref<1x128xf32, #tpu.memory_space<vmem>>, %arg12: memref<128x128xf32, #tpu.memory_space<vmem>>, %arg13: memref<1x128xf32, #tpu.memory_space<vmem>>, %arg14: memref<8x8x32xf32, #tpu.memory_space<vmem>>, %arg15: memref<8x32xf32, #tpu.memory_space<vmem>>, %arg16: memref<8x32xf32, #tpu.memory_space<vmem>>, %arg17: memref<8x8x128xf32, #tpu.memory_space<vmem>>, %arg18: memref<8x32xf32, #tpu.memory_space<vmem>>, %arg19: memref<8x32xf32, #tpu.memory_space<vmem>>) attributes {dimension_semantics = [#tpu.dimension_semantics<parallel>, #tpu.dimension_semantics<arbitrary>], iteration_bounds = array<i64: 1, 1>, scalar_prefetch = 0 : i64, scratch_operands = 2 : i64, tpu.core_type = #tpu.core_type<tc>, window_params = [{transform_indices = @transform_0, window_bounds = array<i64: 8, 8, 128>}, {transform_indices = @transform_1, window_bounds = array<i64: 8, 32>}, {transform_indices = @transform_2, window_bounds = array<i64: 8, 32>}, {pipeline_mode = #tpu.pipeline_mode<synchronous>, transform_indices = @transform_3, window_bounds = array<i64: 128, 128>}, {pipeline_mode = #tpu.pipeline_mode<synchronous>, transform_indices = @transform_4, window_bounds = array<i64: 32, 128>}, {pipeline_mode = #tpu.pipeline_mode<synchronous>, transform_indices = @transform_5, window_bounds = array<i64: 1, 128>}, {pipeline_mode = #tpu.pipeline_mode<synchronous>, transform_indices = @transform_6, window_bounds = array<i64: 32, 128>}, {pipeline_mode = #tpu.pipeline_mode<synchronous>, transform_indices = @transform_7, window_bounds = array<i64: 1, 128>}, {pipeline_mode = #tpu.pipeline_mode<synchronous>, transform_indices = @transform_8, window_bounds = array<i64: 128, 128>}, {pipeline_mode = #tpu.pipeline_mode<synchronous>, transform_indices = @transform_9, window_bounds = array<i64: 1, 128>}, {pipeline_mode = #tpu.pipeline_mode<synchronous>, transform_indices = @transform_10, window_bounds = array<i64: 128, 128>}, {pipeline_mode = #tpu.pipeline_mode<synchronous>, transform_indices = @transform_11, window_bounds = array<i64: 1, 128>}, {transform_indices = @transform_12, window_bounds = array<i64: 8, 8, 32>}, {transform_indices = @transform_13, window_bounds = array<i64: 8, 32>}, {transform_indices = @transform_14, window_bounds = array<i64: 8, 32>}, {transform_indices = @transform_15, window_bounds = array<i64: 8, 8, 128>}]} {
    %c0_i32 = arith.constant 0 : i32
    %0 = arith.cmpi eq, %arg1, %c0_i32 : i32
    %1 = arith.extui %0 : i1 to i32
    %c0_i32_0 = arith.constant 0 : i32
    %2 = arith.cmpi ne, %1, %c0_i32_0 : i32
    scf.if %2 {
      %c0_209 = arith.constant 0 : index
      %c0_210 = arith.constant 0 : index
      %381 = vector.load %arg3[%c0_209, %c0_210] : memref<8x32xf32, #tpu.memory_space<vmem>>, vector<8x32xf32>
      %c0_211 = arith.constant 0 : index
      %c0_212 = arith.constant 0 : index
      %382 = vector.load %arg18[%c0_211, %c0_212] : memref<8x32xf32, #tpu.memory_space<vmem>>, vector<8x32xf32>
      tpu.vector_store %arg18[%c0_211, %c0_212], %381 {strides = array<i32>} : memref<8x32xf32, #tpu.memory_space<vmem>>, vector<8x32xf32>,
      %c0_213 = arith.constant 0 : index
      %c0_214 = arith.constant 0 : index
      %383 = vector.load %arg4[%c0_213, %c0_214] : memref<8x32xf32, #tpu.memory_space<vmem>>, vector<8x32xf32>
      %c0_215 = arith.constant 0 : index
      %c0_216 = arith.constant 0 : index
      %384 = vector.load %arg19[%c0_215, %c0_216] : memref<8x32xf32, #tpu.memory_space<vmem>>, vector<8x32xf32>
      tpu.vector_store %arg19[%c0_215, %c0_216], %383 {strides = array<i32>} : memref<8x32xf32, #tpu.memory_space<vmem>>, vector<8x32xf32>,
    } else {
    }
    %c0_i32_1 = arith.constant 0 : i32
    %c0 = arith.constant 0 : index
    %c0_2 = arith.constant 0 : index
    %3 = vector.load %arg18[%c0, %c0_2] : memref<8x32xf32, #tpu.memory_space<vmem>>, vector<8x32xf32>
    %c0_3 = arith.constant 0 : index
    %c0_4 = arith.constant 0 : index
    %4 = vector.load %arg19[%c0_3, %c0_4] : memref<8x32xf32, #tpu.memory_space<vmem>>, vector<8x32xf32>
    %5 = arith.index_cast %c0_i32_1 : i32 to index
    %c0_5 = arith.constant 0 : index
    %c0_6 = arith.constant 0 : index
    %6 = vector.load %arg2[%5, %c0_5, %c0_6] : memref<8x8x128xf32, #tpu.memory_space<vmem>>, vector<1x8x128xf32>
    %7 = vector.shape_cast %6 : vector<1x8x128xf32> to vector<8x128xf32>
    %c0_7 = arith.constant 0 : index
    %c0_8 = arith.constant 0 : index
    %8 = vector.load %arg5[%c0_7, %c0_8] : memref<128x128xf32, #tpu.memory_space<vmem>>, vector<128x128xf32>
    %cst = arith.constant dense<0.000000e+00> : vector<8x128xf32>
    %9 = tpu.matmul %7, %8, %cst {dimension_numbers = #tpu.dot_dimension_numbers<[1], [0], [0], [1], [0, 0, 1, 1], [], []>} : vector<8x128xf32>, vector<128x128xf32>, vector<8x128xf32> -> vector<8x128xf32>
    %c0_9 = arith.constant 0 : index
    %c0_10 = arith.constant 0 : index
    %10 = vector.load %arg6[%c0_9, %c0_10] : memref<32x128xf32, #tpu.memory_space<vmem>>, vector<32x128xf32>
    %cst_11 = arith.constant dense<0.000000e+00> : vector<8x128xf32>
    %11 = tpu.matmul %3, %10, %cst_11 {dimension_numbers = #tpu.dot_dimension_numbers<[1], [0], [0], [1], [0, 0, 1, 1], [], []>} : vector<8x32xf32>, vector<32x128xf32>, vector<8x128xf32> -> vector<8x128xf32>
    %12 = arith.addf %9, %11 : vector<8x128xf32>
    %c0_12 = arith.constant 0 : index
    %c0_13 = arith.constant 0 : index
    %13 = vector.load %arg7[%c0_12, %c0_13] : memref<1x128xf32, #tpu.memory_space<vmem>>, vector<1x128xf32>
    %14 = vector.broadcast %13 : vector<1x128xf32> to vector<8x128xf32>
    %15 = arith.addf %12, %14 : vector<8x128xf32>
    %16 = vector.extract_strided_slice %15 {offsets = [0, 0], sizes = [8, 32], strides = [1, 1]} : vector<8x128xf32> to vector<8x32xf32>
    %17 = arith.negf %16 : vector<8x32xf32>
    %18 = math.exp %17 : vector<8x32xf32>
    %cst_14 = arith.constant 1.000000e+00 : f32
    %19 = vector.broadcast %cst_14 : f32 to vector<8x32xf32>
    %20 = arith.addf %19, %18 : vector<8x32xf32>
    %21 = arith.divf %19, %20 : vector<8x32xf32>
    %22 = vector.extract_strided_slice %15 {offsets = [0, 32], sizes = [8, 32], strides = [1, 1]} : vector<8x128xf32> to vector<8x32xf32>
    %23 = arith.negf %22 : vector<8x32xf32>
    %24 = math.exp %23 : vector<8x32xf32>
    %cst_15 = arith.constant 1.000000e+00 : f32
    %25 = vector.broadcast %cst_15 : f32 to vector<8x32xf32>
    %26 = arith.addf %25, %24 : vector<8x32xf32>
    %27 = arith.divf %25, %26 : vector<8x32xf32>
    %28 = vector.extract_strided_slice %15 {offsets = [0, 64], sizes = [8, 32], strides = [1, 1]} : vector<8x128xf32> to vector<8x32xf32>
    %29 = math.tanh %28 : vector<8x32xf32>
    %30 = vector.extract_strided_slice %15 {offsets = [0, 96], sizes = [8, 32], strides = [1, 1]} : vector<8x128xf32> to vector<8x32xf32>
    %31 = arith.negf %30 : vector<8x32xf32>
    %32 = math.exp %31 : vector<8x32xf32>
    %cst_16 = arith.constant 1.000000e+00 : f32
    %33 = vector.broadcast %cst_16 : f32 to vector<8x32xf32>
    %34 = arith.addf %33, %32 : vector<8x32xf32>
    %35 = arith.divf %33, %34 : vector<8x32xf32>
    %36 = arith.mulf %27, %4 : vector<8x32xf32>
    %37 = arith.mulf %21, %29 : vector<8x32xf32>
    %38 = arith.addf %36, %37 : vector<8x32xf32>
    %39 = math.tanh %38 : vector<8x32xf32>
    %40 = arith.mulf %35, %39 : vector<8x32xf32>
    %c0_17 = arith.constant 0 : index
    %c0_18 = arith.constant 0 : index
    %41 = vector.load %arg18[%c0_17, %c0_18] : memref<8x32xf32, #tpu.memory_space<vmem>>, vector<8x32xf32>
    tpu.vector_store %arg18[%c0_17, %c0_18], %40 {strides = array<i32>} : memref<8x32xf32, #tpu.memory_space<vmem>>, vector<8x32xf32>,
    %c0_19 = arith.constant 0 : index
    %c0_20 = arith.constant 0 : index
    %42 = vector.load %arg19[%c0_19, %c0_20] : memref<8x32xf32, #tpu.memory_space<vmem>>, vector<8x32xf32>
    tpu.vector_store %arg19[%c0_19, %c0_20], %38 {strides = array<i32>} : memref<8x32xf32, #tpu.memory_space<vmem>>, vector<8x32xf32>,
    %43 = arith.index_cast %c0_i32_1 : i32 to index
    %c0_21 = arith.constant 0 : index
    %c0_22 = arith.constant 0 : index
    %44 = vector.load %arg14[%43, %c0_21, %c0_22] : memref<8x8x32xf32, #tpu.memory_space<vmem>>, vector<1x8x32xf32>
    %45 = vector.shape_cast %44 : vector<1x8x32xf32> to vector<8x32xf32>
    %46 = vector.shape_cast %40 : vector<8x32xf32> to vector<1x8x32xf32>
    tpu.vector_store %arg14[%43, %c0_21, %c0_22], %46 {strides = array<i32>} : memref<8x8x32xf32, #tpu.memory_space<vmem>>, vector<1x8x32xf32>,
    %c1_i32 = arith.constant 1 : i32
    %c0_23 = arith.constant 0 : index
    %c0_24 = arith.constant 0 : index
    %47 = vector.load %arg18[%c0_23, %c0_24] : memref<8x32xf32, #tpu.memory_space<vmem>>, vector<8x32xf32>
    %c0_25 = arith.constant 0 : index
    %c0_26 = arith.constant 0 : index
    %48 = vector.load %arg19[%c0_25, %c0_26] : memref<8x32xf32, #tpu.memory_space<vmem>>, vector<8x32xf32>
    %49 = arith.index_cast %c1_i32 : i32 to index
    %c0_27 = arith.constant 0 : index
    %c0_28 = arith.constant 0 : index
    %50 = vector.load %arg2[%49, %c0_27, %c0_28] : memref<8x8x128xf32, #tpu.memory_space<vmem>>, vector<1x8x128xf32>
    %51 = vector.shape_cast %50 : vector<1x8x128xf32> to vector<8x128xf32>
    %c0_29 = arith.constant 0 : index
    %c0_30 = arith.constant 0 : index
    %52 = vector.load %arg5[%c0_29, %c0_30] : memref<128x128xf32, #tpu.memory_space<vmem>>, vector<128x128xf32>
    %cst_31 = arith.constant dense<0.000000e+00> : vector<8x128xf32>
    %53 = tpu.matmul %51, %52, %cst_31 {dimension_numbers = #tpu.dot_dimension_numbers<[1], [0], [0], [1], [0, 0, 1, 1], [], []>} : vector<8x128xf32>, vector<128x128xf32>, vector<8x128xf32> -> vector<8x128xf32>
    %c0_32 = arith.constant 0 : index
    %c0_33 = arith.constant 0 : index
    %54 = vector.load %arg6[%c0_32, %c0_33] : memref<32x128xf32, #tpu.memory_space<vmem>>, vector<32x128xf32>
    %cst_34 = arith.constant dense<0.000000e+00> : vector<8x128xf32>
    %55 = tpu.matmul %47, %54, %cst_34 {dimension_numbers = #tpu.dot_dimension_numbers<[1], [0], [0], [1], [0, 0, 1, 1], [], []>} : vector<8x32xf32>, vector<32x128xf32>, vector<8x128xf32> -> vector<8x128xf32>
    %56 = arith.addf %53, %55 : vector<8x128xf32>
    %c0_35 = arith.constant 0 : index
    %c0_36 = arith.constant 0 : index
    %57 = vector.load %arg7[%c0_35, %c0_36] : memref<1x128xf32, #tpu.memory_space<vmem>>, vector<1x128xf32>
    %58 = vector.broadcast %57 : vector<1x128xf32> to vector<8x128xf32>
    %59 = arith.addf %56, %58 : vector<8x128xf32>
    %60 = vector.extract_strided_slice %59 {offsets = [0, 0], sizes = [8, 32], strides = [1, 1]} : vector<8x128xf32> to vector<8x32xf32>
    %61 = arith.negf %60 : vector<8x32xf32>
    %62 = math.exp %61 : vector<8x32xf32>
    %cst_37 = arith.constant 1.000000e+00 : f32
    %63 = vector.broadcast %cst_37 : f32 to vector<8x32xf32>
    %64 = arith.addf %63, %62 : vector<8x32xf32>
    %65 = arith.divf %63, %64 : vector<8x32xf32>
    %66 = vector.extract_strided_slice %59 {offsets = [0, 32], sizes = [8, 32], strides = [1, 1]} : vector<8x128xf32> to vector<8x32xf32>
    %67 = arith.negf %66 : vector<8x32xf32>
    %68 = math.exp %67 : vector<8x32xf32>
    %cst_38 = arith.constant 1.000000e+00 : f32
    %69 = vector.broadcast %cst_38 : f32 to vector<8x32xf32>
    %70 = arith.addf %69, %68 : vector<8x32xf32>
    %71 = arith.divf %69, %70 : vector<8x32xf32>
    %72 = vector.extract_strided_slice %59 {offsets = [0, 64], sizes = [8, 32], strides = [1, 1]} : vector<8x128xf32> to vector<8x32xf32>
    %73 = math.tanh %72 : vector<8x32xf32>
    %74 = vector.extract_strided_slice %59 {offsets = [0, 96], sizes = [8, 32], strides = [1, 1]} : vector<8x128xf32> to vector<8x32xf32>
    %75 = arith.negf %74 : vector<8x32xf32>
    %76 = math.exp %75 : vector<8x32xf32>
    %cst_39 = arith.constant 1.000000e+00 : f32
    %77 = vector.broadcast %cst_39 : f32 to vector<8x32xf32>
    %78 = arith.addf %77, %76 : vector<8x32xf32>
    %79 = arith.divf %77, %78 : vector<8x32xf32>
    %80 = arith.mulf %71, %48 : vector<8x32xf32>
    %81 = arith.mulf %65, %73 : vector<8x32xf32>
    %82 = arith.addf %80, %81 : vector<8x32xf32>
    %83 = math.tanh %82 : vector<8x32xf32>
    %84 = arith.mulf %79, %83 : vector<8x32xf32>
    %c0_40 = arith.constant 0 : index
    %c0_41 = arith.constant 0 : index
    %85 = vector.load %arg18[%c0_40, %c0_41] : memref<8x32xf32, #tpu.memory_space<vmem>>, vector<8x32xf32>
    tpu.vector_store %arg18[%c0_40, %c0_41], %84 {strides = array<i32>} : memref<8x32xf32, #tpu.memory_space<vmem>>, vector<8x32xf32>,
    %c0_42 = arith.constant 0 : index
    %c0_43 = arith.constant 0 : index
    %86 = vector.load %arg19[%c0_42, %c0_43] : memref<8x32xf32, #tpu.memory_space<vmem>>, vector<8x32xf32>
    tpu.vector_store %arg19[%c0_42, %c0_43], %82 {strides = array<i32>} : memref<8x32xf32, #tpu.memory_space<vmem>>, vector<8x32xf32>,
    %87 = arith.index_cast %c1_i32 : i32 to index
    %c0_44 = arith.constant 0 : index
    %c0_45 = arith.constant 0 : index
    %88 = vector.load %arg14[%87, %c0_44, %c0_45] : memref<8x8x32xf32, #tpu.memory_space<vmem>>, vector<1x8x32xf32>
    %89 = vector.shape_cast %88 : vector<1x8x32xf32> to vector<8x32xf32>
    %90 = vector.shape_cast %84 : vector<8x32xf32> to vector<1x8x32xf32>
    tpu.vector_store %arg14[%87, %c0_44, %c0_45], %90 {strides = array<i32>} : memref<8x8x32xf32, #tpu.memory_space<vmem>>, vector<1x8x32xf32>,
    %c2_i32 = arith.constant 2 : i32
    %c0_46 = arith.constant 0 : index
    %c0_47 = arith.constant 0 : index
    %91 = vector.load %arg18[%c0_46, %c0_47] : memref<8x32xf32, #tpu.memory_space<vmem>>, vector<8x32xf32>
    %c0_48 = arith.constant 0 : index
    %c0_49 = arith.constant 0 : index
    %92 = vector.load %arg19[%c0_48, %c0_49] : memref<8x32xf32, #tpu.memory_space<vmem>>, vector<8x32xf32>
    %93 = arith.index_cast %c2_i32 : i32 to index
    %c0_50 = arith.constant 0 : index
    %c0_51 = arith.constant 0 : index
    %94 = vector.load %arg2[%93, %c0_50, %c0_51] : memref<8x8x128xf32, #tpu.memory_space<vmem>>, vector<1x8x128xf32>
    %95 = vector.shape_cast %94 : vector<1x8x128xf32> to vector<8x128xf32>
    %c0_52 = arith.constant 0 : index
    %c0_53 = arith.constant 0 : index
    %96 = vector.load %arg5[%c0_52, %c0_53] : memref<128x128xf32, #tpu.memory_space<vmem>>, vector<128x128xf32>
    %cst_54 = arith.constant dense<0.000000e+00> : vector<8x128xf32>
    %97 = tpu.matmul %95, %96, %cst_54 {dimension_numbers = #tpu.dot_dimension_numbers<[1], [0], [0], [1], [0, 0, 1, 1], [], []>} : vector<8x128xf32>, vector<128x128xf32>, vector<8x128xf32> -> vector<8x128xf32>
    %c0_55 = arith.constant 0 : index
    %c0_56 = arith.constant 0 : index
    %98 = vector.load %arg6[%c0_55, %c0_56] : memref<32x128xf32, #tpu.memory_space<vmem>>, vector<32x128xf32>
    %cst_57 = arith.constant dense<0.000000e+00> : vector<8x128xf32>
    %99 = tpu.matmul %91, %98, %cst_57 {dimension_numbers = #tpu.dot_dimension_numbers<[1], [0], [0], [1], [0, 0, 1, 1], [], []>} : vector<8x32xf32>, vector<32x128xf32>, vector<8x128xf32> -> vector<8x128xf32>
    %100 = arith.addf %97, %99 : vector<8x128xf32>
    %c0_58 = arith.constant 0 : index
    %c0_59 = arith.constant 0 : index
    %101 = vector.load %arg7[%c0_58, %c0_59] : memref<1x128xf32, #tpu.memory_space<vmem>>, vector<1x128xf32>
    %102 = vector.broadcast %101 : vector<1x128xf32> to vector<8x128xf32>
    %103 = arith.addf %100, %102 : vector<8x128xf32>
    %104 = vector.extract_strided_slice %103 {offsets = [0, 0], sizes = [8, 32], strides = [1, 1]} : vector<8x128xf32> to vector<8x32xf32>
    %105 = arith.negf %104 : vector<8x32xf32>
    %106 = math.exp %105 : vector<8x32xf32>
    %cst_60 = arith.constant 1.000000e+00 : f32
    %107 = vector.broadcast %cst_60 : f32 to vector<8x32xf32>
    %108 = arith.addf %107, %106 : vector<8x32xf32>
    %109 = arith.divf %107, %108 : vector<8x32xf32>
    %110 = vector.extract_strided_slice %103 {offsets = [0, 32], sizes = [8, 32], strides = [1, 1]} : vector<8x128xf32> to vector<8x32xf32>
    %111 = arith.negf %110 : vector<8x32xf32>
    %112 = math.exp %111 : vector<8x32xf32>
    %cst_61 = arith.constant 1.000000e+00 : f32
    %113 = vector.broadcast %cst_61 : f32 to vector<8x32xf32>
    %114 = arith.addf %113, %112 : vector<8x32xf32>
    %115 = arith.divf %113, %114 : vector<8x32xf32>
    %116 = vector.extract_strided_slice %103 {offsets = [0, 64], sizes = [8, 32], strides = [1, 1]} : vector<8x128xf32> to vector<8x32xf32>
    %117 = math.tanh %116 : vector<8x32xf32>
    %118 = vector.extract_strided_slice %103 {offsets = [0, 96], sizes = [8, 32], strides = [1, 1]} : vector<8x128xf32> to vector<8x32xf32>
    %119 = arith.negf %118 : vector<8x32xf32>
    %120 = math.exp %119 : vector<8x32xf32>
    %cst_62 = arith.constant 1.000000e+00 : f32
    %121 = vector.broadcast %cst_62 : f32 to vector<8x32xf32>
    %122 = arith.addf %121, %120 : vector<8x32xf32>
    %123 = arith.divf %121, %122 : vector<8x32xf32>
    %124 = arith.mulf %115, %92 : vector<8x32xf32>
    %125 = arith.mulf %109, %117 : vector<8x32xf32>
    %126 = arith.addf %124, %125 : vector<8x32xf32>
    %127 = math.tanh %126 : vector<8x32xf32>
    %128 = arith.mulf %123, %127 : vector<8x32xf32>
    %c0_63 = arith.constant 0 : index
    %c0_64 = arith.constant 0 : index
    %129 = vector.load %arg18[%c0_63, %c0_64] : memref<8x32xf32, #tpu.memory_space<vmem>>, vector<8x32xf32>
    tpu.vector_store %arg18[%c0_63, %c0_64], %128 {strides = array<i32>} : memref<8x32xf32, #tpu.memory_space<vmem>>, vector<8x32xf32>,
    %c0_65 = arith.constant 0 : index
    %c0_66 = arith.constant 0 : index
    %130 = vector.load %arg19[%c0_65, %c0_66] : memref<8x32xf32, #tpu.memory_space<vmem>>, vector<8x32xf32>
    tpu.vector_store %arg19[%c0_65, %c0_66], %126 {strides = array<i32>} : memref<8x32xf32, #tpu.memory_space<vmem>>, vector<8x32xf32>,
    %131 = arith.index_cast %c2_i32 : i32 to index
    %c0_67 = arith.constant 0 : index
    %c0_68 = arith.constant 0 : index
    %132 = vector.load %arg14[%131, %c0_67, %c0_68] : memref<8x8x32xf32, #tpu.memory_space<vmem>>, vector<1x8x32xf32>
    %133 = vector.shape_cast %132 : vector<1x8x32xf32> to vector<8x32xf32>
    %134 = vector.shape_cast %128 : vector<8x32xf32> to vector<1x8x32xf32>
    tpu.vector_store %arg14[%131, %c0_67, %c0_68], %134 {strides = array<i32>} : memref<8x8x32xf32, #tpu.memory_space<vmem>>, vector<1x8x32xf32>,
    %c3_i32 = arith.constant 3 : i32
    %c0_69 = arith.constant 0 : index
    %c0_70 = arith.constant 0 : index
    %135 = vector.load %arg18[%c0_69, %c0_70] : memref<8x32xf32, #tpu.memory_space<vmem>>, vector<8x32xf32>
    %c0_71 = arith.constant 0 : index
    %c0_72 = arith.constant 0 : index
    %136 = vector.load %arg19[%c0_71, %c0_72] : memref<8x32xf32, #tpu.memory_space<vmem>>, vector<8x32xf32>
    %137 = arith.index_cast %c3_i32 : i32 to index
    %c0_73 = arith.constant 0 : index
    %c0_74 = arith.constant 0 : index
    %138 = vector.load %arg2[%137, %c0_73, %c0_74] : memref<8x8x128xf32, #tpu.memory_space<vmem>>, vector<1x8x128xf32>
    %139 = vector.shape_cast %138 : vector<1x8x128xf32> to vector<8x128xf32>
    %c0_75 = arith.constant 0 : index
    %c0_76 = arith.constant 0 : index
    %140 = vector.load %arg5[%c0_75, %c0_76] : memref<128x128xf32, #tpu.memory_space<vmem>>, vector<128x128xf32>
    %cst_77 = arith.constant dense<0.000000e+00> : vector<8x128xf32>
    %141 = tpu.matmul %139, %140, %cst_77 {dimension_numbers = #tpu.dot_dimension_numbers<[1], [0], [0], [1], [0, 0, 1, 1], [], []>} : vector<8x128xf32>, vector<128x128xf32>, vector<8x128xf32> -> vector<8x128xf32>
    %c0_78 = arith.constant 0 : index
    %c0_79 = arith.constant 0 : index
    %142 = vector.load %arg6[%c0_78, %c0_79] : memref<32x128xf32, #tpu.memory_space<vmem>>, vector<32x128xf32>
    %cst_80 = arith.constant dense<0.000000e+00> : vector<8x128xf32>
    %143 = tpu.matmul %135, %142, %cst_80 {dimension_numbers = #tpu.dot_dimension_numbers<[1], [0], [0], [1], [0, 0, 1, 1], [], []>} : vector<8x32xf32>, vector<32x128xf32>, vector<8x128xf32> -> vector<8x128xf32>
    %144 = arith.addf %141, %143 : vector<8x128xf32>
    %c0_81 = arith.constant 0 : index
    %c0_82 = arith.constant 0 : index
    %145 = vector.load %arg7[%c0_81, %c0_82] : memref<1x128xf32, #tpu.memory_space<vmem>>, vector<1x128xf32>
    %146 = vector.broadcast %145 : vector<1x128xf32> to vector<8x128xf32>
    %147 = arith.addf %144, %146 : vector<8x128xf32>
    %148 = vector.extract_strided_slice %147 {offsets = [0, 0], sizes = [8, 32], strides = [1, 1]} : vector<8x128xf32> to vector<8x32xf32>
    %149 = arith.negf %148 : vector<8x32xf32>
    %150 = math.exp %149 : vector<8x32xf32>
    %cst_83 = arith.constant 1.000000e+00 : f32
    %151 = vector.broadcast %cst_83 : f32 to vector<8x32xf32>
    %152 = arith.addf %151, %150 : vector<8x32xf32>
    %153 = arith.divf %151, %152 : vector<8x32xf32>
    %154 = vector.extract_strided_slice %147 {offsets = [0, 32], sizes = [8, 32], strides = [1, 1]} : vector<8x128xf32> to vector<8x32xf32>
    %155 = arith.negf %154 : vector<8x32xf32>
    %156 = math.exp %155 : vector<8x32xf32>
    %cst_84 = arith.constant 1.000000e+00 : f32
    %157 = vector.broadcast %cst_84 : f32 to vector<8x32xf32>
    %158 = arith.addf %157, %156 : vector<8x32xf32>
    %159 = arith.divf %157, %158 : vector<8x32xf32>
    %160 = vector.extract_strided_slice %147 {offsets = [0, 64], sizes = [8, 32], strides = [1, 1]} : vector<8x128xf32> to vector<8x32xf32>
    %161 = math.tanh %160 : vector<8x32xf32>
    %162 = vector.extract_strided_slice %147 {offsets = [0, 96], sizes = [8, 32], strides = [1, 1]} : vector<8x128xf32> to vector<8x32xf32>
    %163 = arith.negf %162 : vector<8x32xf32>
    %164 = math.exp %163 : vector<8x32xf32>
    %cst_85 = arith.constant 1.000000e+00 : f32
    %165 = vector.broadcast %cst_85 : f32 to vector<8x32xf32>
    %166 = arith.addf %165, %164 : vector<8x32xf32>
    %167 = arith.divf %165, %166 : vector<8x32xf32>
    %168 = arith.mulf %159, %136 : vector<8x32xf32>
    %169 = arith.mulf %153, %161 : vector<8x32xf32>
    %170 = arith.addf %168, %169 : vector<8x32xf32>
    %171 = math.tanh %170 : vector<8x32xf32>
    %172 = arith.mulf %167, %171 : vector<8x32xf32>
    %c0_86 = arith.constant 0 : index
    %c0_87 = arith.constant 0 : index
    %173 = vector.load %arg18[%c0_86, %c0_87] : memref<8x32xf32, #tpu.memory_space<vmem>>, vector<8x32xf32>
    tpu.vector_store %arg18[%c0_86, %c0_87], %172 {strides = array<i32>} : memref<8x32xf32, #tpu.memory_space<vmem>>, vector<8x32xf32>,
    %c0_88 = arith.constant 0 : index
    %c0_89 = arith.constant 0 : index
    %174 = vector.load %arg19[%c0_88, %c0_89] : memref<8x32xf32, #tpu.memory_space<vmem>>, vector<8x32xf32>
    tpu.vector_store %arg19[%c0_88, %c0_89], %170 {strides = array<i32>} : memref<8x32xf32, #tpu.memory_space<vmem>>, vector<8x32xf32>,
    %175 = arith.index_cast %c3_i32 : i32 to index
    %c0_90 = arith.constant 0 : index
    %c0_91 = arith.constant 0 : index
    %176 = vector.load %arg14[%175, %c0_90, %c0_91] : memref<8x8x32xf32, #tpu.memory_space<vmem>>, vector<1x8x32xf32>
    %177 = vector.shape_cast %176 : vector<1x8x32xf32> to vector<8x32xf32>
    %178 = vector.shape_cast %172 : vector<8x32xf32> to vector<1x8x32xf32>
    tpu.vector_store %arg14[%175, %c0_90, %c0_91], %178 {strides = array<i32>} : memref<8x8x32xf32, #tpu.memory_space<vmem>>, vector<1x8x32xf32>,
    %c4_i32 = arith.constant 4 : i32
    %c0_92 = arith.constant 0 : index
    %c0_93 = arith.constant 0 : index
    %179 = vector.load %arg18[%c0_92, %c0_93] : memref<8x32xf32, #tpu.memory_space<vmem>>, vector<8x32xf32>
    %c0_94 = arith.constant 0 : index
    %c0_95 = arith.constant 0 : index
    %180 = vector.load %arg19[%c0_94, %c0_95] : memref<8x32xf32, #tpu.memory_space<vmem>>, vector<8x32xf32>
    %181 = arith.index_cast %c4_i32 : i32 to index
    %c0_96 = arith.constant 0 : index
    %c0_97 = arith.constant 0 : index
    %182 = vector.load %arg2[%181, %c0_96, %c0_97] : memref<8x8x128xf32, #tpu.memory_space<vmem>>, vector<1x8x128xf32>
    %183 = vector.shape_cast %182 : vector<1x8x128xf32> to vector<8x128xf32>
    %c0_98 = arith.constant 0 : index
    %c0_99 = arith.constant 0 : index
    %184 = vector.load %arg5[%c0_98, %c0_99] : memref<128x128xf32, #tpu.memory_space<vmem>>, vector<128x128xf32>
    %cst_100 = arith.constant dense<0.000000e+00> : vector<8x128xf32>
    %185 = tpu.matmul %183, %184, %cst_100 {dimension_numbers = #tpu.dot_dimension_numbers<[1], [0], [0], [1], [0, 0, 1, 1], [], []>} : vector<8x128xf32>, vector<128x128xf32>, vector<8x128xf32> -> vector<8x128xf32>
    %c0_101 = arith.constant 0 : index
    %c0_102 = arith.constant 0 : index
    %186 = vector.load %arg6[%c0_101, %c0_102] : memref<32x128xf32, #tpu.memory_space<vmem>>, vector<32x128xf32>
    %cst_103 = arith.constant dense<0.000000e+00> : vector<8x128xf32>
    %187 = tpu.matmul %179, %186, %cst_103 {dimension_numbers = #tpu.dot_dimension_numbers<[1], [0], [0], [1], [0, 0, 1, 1], [], []>} : vector<8x32xf32>, vector<32x128xf32>, vector<8x128xf32> -> vector<8x128xf32>
    %188 = arith.addf %185, %187 : vector<8x128xf32>
    %c0_104 = arith.constant 0 : index
    %c0_105 = arith.constant 0 : index
    %189 = vector.load %arg7[%c0_104, %c0_105] : memref<1x128xf32, #tpu.memory_space<vmem>>, vector<1x128xf32>
    %190 = vector.broadcast %189 : vector<1x128xf32> to vector<8x128xf32>
    %191 = arith.addf %188, %190 : vector<8x128xf32>
    %192 = vector.extract_strided_slice %191 {offsets = [0, 0], sizes = [8, 32], strides = [1, 1]} : vector<8x128xf32> to vector<8x32xf32>
    %193 = arith.negf %192 : vector<8x32xf32>
    %194 = math.exp %193 : vector<8x32xf32>
    %cst_106 = arith.constant 1.000000e+00 : f32
    %195 = vector.broadcast %cst_106 : f32 to vector<8x32xf32>
    %196 = arith.addf %195, %194 : vector<8x32xf32>
    %197 = arith.divf %195, %196 : vector<8x32xf32>
    %198 = vector.extract_strided_slice %191 {offsets = [0, 32], sizes = [8, 32], strides = [1, 1]} : vector<8x128xf32> to vector<8x32xf32>
    %199 = arith.negf %198 : vector<8x32xf32>
    %200 = math.exp %199 : vector<8x32xf32>
    %cst_107 = arith.constant 1.000000e+00 : f32
    %201 = vector.broadcast %cst_107 : f32 to vector<8x32xf32>
    %202 = arith.addf %201, %200 : vector<8x32xf32>
    %203 = arith.divf %201, %202 : vector<8x32xf32>
    %204 = vector.extract_strided_slice %191 {offsets = [0, 64], sizes = [8, 32], strides = [1, 1]} : vector<8x128xf32> to vector<8x32xf32>
    %205 = math.tanh %204 : vector<8x32xf32>
    %206 = vector.extract_strided_slice %191 {offsets = [0, 96], sizes = [8, 32], strides = [1, 1]} : vector<8x128xf32> to vector<8x32xf32>
    %207 = arith.negf %206 : vector<8x32xf32>
    %208 = math.exp %207 : vector<8x32xf32>
    %cst_108 = arith.constant 1.000000e+00 : f32
    %209 = vector.broadcast %cst_108 : f32 to vector<8x32xf32>
    %210 = arith.addf %209, %208 : vector<8x32xf32>
    %211 = arith.divf %209, %210 : vector<8x32xf32>
    %212 = arith.mulf %203, %180 : vector<8x32xf32>
    %213 = arith.mulf %197, %205 : vector<8x32xf32>
    %214 = arith.addf %212, %213 : vector<8x32xf32>
    %215 = math.tanh %214 : vector<8x32xf32>
    %216 = arith.mulf %211, %215 : vector<8x32xf32>
    %c0_109 = arith.constant 0 : index
    %c0_110 = arith.constant 0 : index
    %217 = vector.load %arg18[%c0_109, %c0_110] : memref<8x32xf32, #tpu.memory_space<vmem>>, vector<8x32xf32>
    tpu.vector_store %arg18[%c0_109, %c0_110], %216 {strides = array<i32>} : memref<8x32xf32, #tpu.memory_space<vmem>>, vector<8x32xf32>,
    %c0_111 = arith.constant 0 : index
    %c0_112 = arith.constant 0 : index
    %218 = vector.load %arg19[%c0_111, %c0_112] : memref<8x32xf32, #tpu.memory_space<vmem>>, vector<8x32xf32>
    tpu.vector_store %arg19[%c0_111, %c0_112], %214 {strides = array<i32>} : memref<8x32xf32, #tpu.memory_space<vmem>>, vector<8x32xf32>,
    %219 = arith.index_cast %c4_i32 : i32 to index
    %c0_113 = arith.constant 0 : index
    %c0_114 = arith.constant 0 : index
    %220 = vector.load %arg14[%219, %c0_113, %c0_114] : memref<8x8x32xf32, #tpu.memory_space<vmem>>, vector<1x8x32xf32>
    %221 = vector.shape_cast %220 : vector<1x8x32xf32> to vector<8x32xf32>
    %222 = vector.shape_cast %216 : vector<8x32xf32> to vector<1x8x32xf32>
    tpu.vector_store %arg14[%219, %c0_113, %c0_114], %222 {strides = array<i32>} : memref<8x8x32xf32, #tpu.memory_space<vmem>>, vector<1x8x32xf32>,
    %c5_i32 = arith.constant 5 : i32
    %c0_115 = arith.constant 0 : index
    %c0_116 = arith.constant 0 : index
    %223 = vector.load %arg18[%c0_115, %c0_116] : memref<8x32xf32, #tpu.memory_space<vmem>>, vector<8x32xf32>
    %c0_117 = arith.constant 0 : index
    %c0_118 = arith.constant 0 : index
    %224 = vector.load %arg19[%c0_117, %c0_118] : memref<8x32xf32, #tpu.memory_space<vmem>>, vector<8x32xf32>
    %225 = arith.index_cast %c5_i32 : i32 to index
    %c0_119 = arith.constant 0 : index
    %c0_120 = arith.constant 0 : index
    %226 = vector.load %arg2[%225, %c0_119, %c0_120] : memref<8x8x128xf32, #tpu.memory_space<vmem>>, vector<1x8x128xf32>
    %227 = vector.shape_cast %226 : vector<1x8x128xf32> to vector<8x128xf32>
    %c0_121 = arith.constant 0 : index
    %c0_122 = arith.constant 0 : index
    %228 = vector.load %arg5[%c0_121, %c0_122] : memref<128x128xf32, #tpu.memory_space<vmem>>, vector<128x128xf32>
    %cst_123 = arith.constant dense<0.000000e+00> : vector<8x128xf32>
    %229 = tpu.matmul %227, %228, %cst_123 {dimension_numbers = #tpu.dot_dimension_numbers<[1], [0], [0], [1], [0, 0, 1, 1], [], []>} : vector<8x128xf32>, vector<128x128xf32>, vector<8x128xf32> -> vector<8x128xf32>
    %c0_124 = arith.constant 0 : index
    %c0_125 = arith.constant 0 : index
    %230 = vector.load %arg6[%c0_124, %c0_125] : memref<32x128xf32, #tpu.memory_space<vmem>>, vector<32x128xf32>
    %cst_126 = arith.constant dense<0.000000e+00> : vector<8x128xf32>
    %231 = tpu.matmul %223, %230, %cst_126 {dimension_numbers = #tpu.dot_dimension_numbers<[1], [0], [0], [1], [0, 0, 1, 1], [], []>} : vector<8x32xf32>, vector<32x128xf32>, vector<8x128xf32> -> vector<8x128xf32>
    %232 = arith.addf %229, %231 : vector<8x128xf32>
    %c0_127 = arith.constant 0 : index
    %c0_128 = arith.constant 0 : index
    %233 = vector.load %arg7[%c0_127, %c0_128] : memref<1x128xf32, #tpu.memory_space<vmem>>, vector<1x128xf32>
    %234 = vector.broadcast %233 : vector<1x128xf32> to vector<8x128xf32>
    %235 = arith.addf %232, %234 : vector<8x128xf32>
    %236 = vector.extract_strided_slice %235 {offsets = [0, 0], sizes = [8, 32], strides = [1, 1]} : vector<8x128xf32> to vector<8x32xf32>
    %237 = arith.negf %236 : vector<8x32xf32>
    %238 = math.exp %237 : vector<8x32xf32>
    %cst_129 = arith.constant 1.000000e+00 : f32
    %239 = vector.broadcast %cst_129 : f32 to vector<8x32xf32>
    %240 = arith.addf %239, %238 : vector<8x32xf32>
    %241 = arith.divf %239, %240 : vector<8x32xf32>
    %242 = vector.extract_strided_slice %235 {offsets = [0, 32], sizes = [8, 32], strides = [1, 1]} : vector<8x128xf32> to vector<8x32xf32>
    %243 = arith.negf %242 : vector<8x32xf32>
    %244 = math.exp %243 : vector<8x32xf32>
    %cst_130 = arith.constant 1.000000e+00 : f32
    %245 = vector.broadcast %cst_130 : f32 to vector<8x32xf32>
    %246 = arith.addf %245, %244 : vector<8x32xf32>
    %247 = arith.divf %245, %246 : vector<8x32xf32>
    %248 = vector.extract_strided_slice %235 {offsets = [0, 64], sizes = [8, 32], strides = [1, 1]} : vector<8x128xf32> to vector<8x32xf32>
    %249 = math.tanh %248 : vector<8x32xf32>
    %250 = vector.extract_strided_slice %235 {offsets = [0, 96], sizes = [8, 32], strides = [1, 1]} : vector<8x128xf32> to vector<8x32xf32>
    %251 = arith.negf %250 : vector<8x32xf32>
    %252 = math.exp %251 : vector<8x32xf32>
    %cst_131 = arith.constant 1.000000e+00 : f32
    %253 = vector.broadcast %cst_131 : f32 to vector<8x32xf32>
    %254 = arith.addf %253, %252 : vector<8x32xf32>
    %255 = arith.divf %253, %254 : vector<8x32xf32>
    %256 = arith.mulf %247, %224 : vector<8x32xf32>
    %257 = arith.mulf %241, %249 : vector<8x32xf32>
    %258 = arith.addf %256, %257 : vector<8x32xf32>
    %259 = math.tanh %258 : vector<8x32xf32>
    %260 = arith.mulf %255, %259 : vector<8x32xf32>
    %c0_132 = arith.constant 0 : index
    %c0_133 = arith.constant 0 : index
    %261 = vector.load %arg18[%c0_132, %c0_133] : memref<8x32xf32, #tpu.memory_space<vmem>>, vector<8x32xf32>
    tpu.vector_store %arg18[%c0_132, %c0_133], %260 {strides = array<i32>} : memref<8x32xf32, #tpu.memory_space<vmem>>, vector<8x32xf32>,
    %c0_134 = arith.constant 0 : index
    %c0_135 = arith.constant 0 : index
    %262 = vector.load %arg19[%c0_134, %c0_135] : memref<8x32xf32, #tpu.memory_space<vmem>>, vector<8x32xf32>
    tpu.vector_store %arg19[%c0_134, %c0_135], %258 {strides = array<i32>} : memref<8x32xf32, #tpu.memory_space<vmem>>, vector<8x32xf32>,
    %263 = arith.index_cast %c5_i32 : i32 to index
    %c0_136 = arith.constant 0 : index
    %c0_137 = arith.constant 0 : index
    %264 = vector.load %arg14[%263, %c0_136, %c0_137] : memref<8x8x32xf32, #tpu.memory_space<vmem>>, vector<1x8x32xf32>
    %265 = vector.shape_cast %264 : vector<1x8x32xf32> to vector<8x32xf32>
    %266 = vector.shape_cast %260 : vector<8x32xf32> to vector<1x8x32xf32>
    tpu.vector_store %arg14[%263, %c0_136, %c0_137], %266 {strides = array<i32>} : memref<8x8x32xf32, #tpu.memory_space<vmem>>, vector<1x8x32xf32>,
    %c6_i32 = arith.constant 6 : i32
    %c0_138 = arith.constant 0 : index
    %c0_139 = arith.constant 0 : index
    %267 = vector.load %arg18[%c0_138, %c0_139] : memref<8x32xf32, #tpu.memory_space<vmem>>, vector<8x32xf32>
    %c0_140 = arith.constant 0 : index
    %c0_141 = arith.constant 0 : index
    %268 = vector.load %arg19[%c0_140, %c0_141] : memref<8x32xf32, #tpu.memory_space<vmem>>, vector<8x32xf32>
    %269 = arith.index_cast %c6_i32 : i32 to index
    %c0_142 = arith.constant 0 : index
    %c0_143 = arith.constant 0 : index
    %270 = vector.load %arg2[%269, %c0_142, %c0_143] : memref<8x8x128xf32, #tpu.memory_space<vmem>>, vector<1x8x128xf32>
    %271 = vector.shape_cast %270 : vector<1x8x128xf32> to vector<8x128xf32>
    %c0_144 = arith.constant 0 : index
    %c0_145 = arith.constant 0 : index
    %272 = vector.load %arg5[%c0_144, %c0_145] : memref<128x128xf32, #tpu.memory_space<vmem>>, vector<128x128xf32>
    %cst_146 = arith.constant dense<0.000000e+00> : vector<8x128xf32>
    %273 = tpu.matmul %271, %272, %cst_146 {dimension_numbers = #tpu.dot_dimension_numbers<[1], [0], [0], [1], [0, 0, 1, 1], [], []>} : vector<8x128xf32>, vector<128x128xf32>, vector<8x128xf32> -> vector<8x128xf32>
    %c0_147 = arith.constant 0 : index
    %c0_148 = arith.constant 0 : index
    %274 = vector.load %arg6[%c0_147, %c0_148] : memref<32x128xf32, #tpu.memory_space<vmem>>, vector<32x128xf32>
    %cst_149 = arith.constant dense<0.000000e+00> : vector<8x128xf32>
    %275 = tpu.matmul %267, %274, %cst_149 {dimension_numbers = #tpu.dot_dimension_numbers<[1], [0], [0], [1], [0, 0, 1, 1], [], []>} : vector<8x32xf32>, vector<32x128xf32>, vector<8x128xf32> -> vector<8x128xf32>
    %276 = arith.addf %273, %275 : vector<8x128xf32>
    %c0_150 = arith.constant 0 : index
    %c0_151 = arith.constant 0 : index
    %277 = vector.load %arg7[%c0_150, %c0_151] : memref<1x128xf32, #tpu.memory_space<vmem>>, vector<1x128xf32>
    %278 = vector.broadcast %277 : vector<1x128xf32> to vector<8x128xf32>
    %279 = arith.addf %276, %278 : vector<8x128xf32>
    %280 = vector.extract_strided_slice %279 {offsets = [0, 0], sizes = [8, 32], strides = [1, 1]} : vector<8x128xf32> to vector<8x32xf32>
    %281 = arith.negf %280 : vector<8x32xf32>
    %282 = math.exp %281 : vector<8x32xf32>
    %cst_152 = arith.constant 1.000000e+00 : f32
    %283 = vector.broadcast %cst_152 : f32 to vector<8x32xf32>
    %284 = arith.addf %283, %282 : vector<8x32xf32>
    %285 = arith.divf %283, %284 : vector<8x32xf32>
    %286 = vector.extract_strided_slice %279 {offsets = [0, 32], sizes = [8, 32], strides = [1, 1]} : vector<8x128xf32> to vector<8x32xf32>
    %287 = arith.negf %286 : vector<8x32xf32>
    %288 = math.exp %287 : vector<8x32xf32>
    %cst_153 = arith.constant 1.000000e+00 : f32
    %289 = vector.broadcast %cst_153 : f32 to vector<8x32xf32>
    %290 = arith.addf %289, %288 : vector<8x32xf32>
    %291 = arith.divf %289, %290 : vector<8x32xf32>
    %292 = vector.extract_strided_slice %279 {offsets = [0, 64], sizes = [8, 32], strides = [1, 1]} : vector<8x128xf32> to vector<8x32xf32>
    %293 = math.tanh %292 : vector<8x32xf32>
    %294 = vector.extract_strided_slice %279 {offsets = [0, 96], sizes = [8, 32], strides = [1, 1]} : vector<8x128xf32> to vector<8x32xf32>
    %295 = arith.negf %294 : vector<8x32xf32>
    %296 = math.exp %295 : vector<8x32xf32>
    %cst_154 = arith.constant 1.000000e+00 : f32
    %297 = vector.broadcast %cst_154 : f32 to vector<8x32xf32>
    %298 = arith.addf %297, %296 : vector<8x32xf32>
    %299 = arith.divf %297, %298 : vector<8x32xf32>
    %300 = arith.mulf %291, %268 : vector<8x32xf32>
    %301 = arith.mulf %285, %293 : vector<8x32xf32>
    %302 = arith.addf %300, %301 : vector<8x32xf32>
    %303 = math.tanh %302 : vector<8x32xf32>
    %304 = arith.mulf %299, %303 : vector<8x32xf32>
    %c0_155 = arith.constant 0 : index
    %c0_156 = arith.constant 0 : index
    %305 = vector.load %arg18[%c0_155, %c0_156] : memref<8x32xf32, #tpu.memory_space<vmem>>, vector<8x32xf32>
    tpu.vector_store %arg18[%c0_155, %c0_156], %304 {strides = array<i32>} : memref<8x32xf32, #tpu.memory_space<vmem>>, vector<8x32xf32>,
    %c0_157 = arith.constant 0 : index
    %c0_158 = arith.constant 0 : index
    %306 = vector.load %arg19[%c0_157, %c0_158] : memref<8x32xf32, #tpu.memory_space<vmem>>, vector<8x32xf32>
    tpu.vector_store %arg19[%c0_157, %c0_158], %302 {strides = array<i32>} : memref<8x32xf32, #tpu.memory_space<vmem>>, vector<8x32xf32>,
    %307 = arith.index_cast %c6_i32 : i32 to index
    %c0_159 = arith.constant 0 : index
    %c0_160 = arith.constant 0 : index
    %308 = vector.load %arg14[%307, %c0_159, %c0_160] : memref<8x8x32xf32, #tpu.memory_space<vmem>>, vector<1x8x32xf32>
    %309 = vector.shape_cast %308 : vector<1x8x32xf32> to vector<8x32xf32>
    %310 = vector.shape_cast %304 : vector<8x32xf32> to vector<1x8x32xf32>
    tpu.vector_store %arg14[%307, %c0_159, %c0_160], %310 {strides = array<i32>} : memref<8x8x32xf32, #tpu.memory_space<vmem>>, vector<1x8x32xf32>,
    %c7_i32 = arith.constant 7 : i32
    %c0_161 = arith.constant 0 : index
    %c0_162 = arith.constant 0 : index
    %311 = vector.load %arg18[%c0_161, %c0_162] : memref<8x32xf32, #tpu.memory_space<vmem>>, vector<8x32xf32>
    %c0_163 = arith.constant 0 : index
    %c0_164 = arith.constant 0 : index
    %312 = vector.load %arg19[%c0_163, %c0_164] : memref<8x32xf32, #tpu.memory_space<vmem>>, vector<8x32xf32>
    %313 = arith.index_cast %c7_i32 : i32 to index
    %c0_165 = arith.constant 0 : index
    %c0_166 = arith.constant 0 : index
    %314 = vector.load %arg2[%313, %c0_165, %c0_166] : memref<8x8x128xf32, #tpu.memory_space<vmem>>, vector<1x8x128xf32>
    %315 = vector.shape_cast %314 : vector<1x8x128xf32> to vector<8x128xf32>
    %c0_167 = arith.constant 0 : index
    %c0_168 = arith.constant 0 : index
    %316 = vector.load %arg5[%c0_167, %c0_168] : memref<128x128xf32, #tpu.memory_space<vmem>>, vector<128x128xf32>
    %cst_169 = arith.constant dense<0.000000e+00> : vector<8x128xf32>
    %317 = tpu.matmul %315, %316, %cst_169 {dimension_numbers = #tpu.dot_dimension_numbers<[1], [0], [0], [1], [0, 0, 1, 1], [], []>} : vector<8x128xf32>, vector<128x128xf32>, vector<8x128xf32> -> vector<8x128xf32>
    %c0_170 = arith.constant 0 : index
    %c0_171 = arith.constant 0 : index
    %318 = vector.load %arg6[%c0_170, %c0_171] : memref<32x128xf32, #tpu.memory_space<vmem>>, vector<32x128xf32>
    %cst_172 = arith.constant dense<0.000000e+00> : vector<8x128xf32>
    %319 = tpu.matmul %311, %318, %cst_172 {dimension_numbers = #tpu.dot_dimension_numbers<[1], [0], [0], [1], [0, 0, 1, 1], [], []>} : vector<8x32xf32>, vector<32x128xf32>, vector<8x128xf32> -> vector<8x128xf32>
    %320 = arith.addf %317, %319 : vector<8x128xf32>
    %c0_173 = arith.constant 0 : index
    %c0_174 = arith.constant 0 : index
    %321 = vector.load %arg7[%c0_173, %c0_174] : memref<1x128xf32, #tpu.memory_space<vmem>>, vector<1x128xf32>
    %322 = vector.broadcast %321 : vector<1x128xf32> to vector<8x128xf32>
    %323 = arith.addf %320, %322 : vector<8x128xf32>
    %324 = vector.extract_strided_slice %323 {offsets = [0, 0], sizes = [8, 32], strides = [1, 1]} : vector<8x128xf32> to vector<8x32xf32>
    %325 = arith.negf %324 : vector<8x32xf32>
    %326 = math.exp %325 : vector<8x32xf32>
    %cst_175 = arith.constant 1.000000e+00 : f32
    %327 = vector.broadcast %cst_175 : f32 to vector<8x32xf32>
    %328 = arith.addf %327, %326 : vector<8x32xf32>
    %329 = arith.divf %327, %328 : vector<8x32xf32>
    %330 = vector.extract_strided_slice %323 {offsets = [0, 32], sizes = [8, 32], strides = [1, 1]} : vector<8x128xf32> to vector<8x32xf32>
    %331 = arith.negf %330 : vector<8x32xf32>
    %332 = math.exp %331 : vector<8x32xf32>
    %cst_176 = arith.constant 1.000000e+00 : f32
    %333 = vector.broadcast %cst_176 : f32 to vector<8x32xf32>
    %334 = arith.addf %333, %332 : vector<8x32xf32>
    %335 = arith.divf %333, %334 : vector<8x32xf32>
    %336 = vector.extract_strided_slice %323 {offsets = [0, 64], sizes = [8, 32], strides = [1, 1]} : vector<8x128xf32> to vector<8x32xf32>
    %337 = math.tanh %336 : vector<8x32xf32>
    %338 = vector.extract_strided_slice %323 {offsets = [0, 96], sizes = [8, 32], strides = [1, 1]} : vector<8x128xf32> to vector<8x32xf32>
    %339 = arith.negf %338 : vector<8x32xf32>
    %340 = math.exp %339 : vector<8x32xf32>
    %cst_177 = arith.constant 1.000000e+00 : f32
    %341 = vector.broadcast %cst_177 : f32 to vector<8x32xf32>
    %342 = arith.addf %341, %340 : vector<8x32xf32>
    %343 = arith.divf %341, %342 : vector<8x32xf32>
    %344 = arith.mulf %335, %312 : vector<8x32xf32>
    %345 = arith.mulf %329, %337 : vector<8x32xf32>
    %346 = arith.addf %344, %345 : vector<8x32xf32>
    %347 = math.tanh %346 : vector<8x32xf32>
    %348 = arith.mulf %343, %347 : vector<8x32xf32>
    %c0_178 = arith.constant 0 : index
    %c0_179 = arith.constant 0 : index
    %349 = vector.load %arg18[%c0_178, %c0_179] : memref<8x32xf32, #tpu.memory_space<vmem>>, vector<8x32xf32>
    tpu.vector_store %arg18[%c0_178, %c0_179], %348 {strides = array<i32>} : memref<8x32xf32, #tpu.memory_space<vmem>>, vector<8x32xf32>,
    %c0_180 = arith.constant 0 : index
    %c0_181 = arith.constant 0 : index
    %350 = vector.load %arg19[%c0_180, %c0_181] : memref<8x32xf32, #tpu.memory_space<vmem>>, vector<8x32xf32>
    tpu.vector_store %arg19[%c0_180, %c0_181], %346 {strides = array<i32>} : memref<8x32xf32, #tpu.memory_space<vmem>>, vector<8x32xf32>,
    %351 = arith.index_cast %c7_i32 : i32 to index
    %c0_182 = arith.constant 0 : index
    %c0_183 = arith.constant 0 : index
    %352 = vector.load %arg14[%351, %c0_182, %c0_183] : memref<8x8x32xf32, #tpu.memory_space<vmem>>, vector<1x8x32xf32>
    %353 = vector.shape_cast %352 : vector<1x8x32xf32> to vector<8x32xf32>
    %354 = vector.shape_cast %348 : vector<8x32xf32> to vector<1x8x32xf32>
    tpu.vector_store %arg14[%351, %c0_182, %c0_183], %354 {strides = array<i32>} : memref<8x8x32xf32, #tpu.memory_space<vmem>>, vector<1x8x32xf32>,
    %c8_i32 = arith.constant 8 : i32
    %c0_i32_184 = arith.constant 0 : i32
    %355 = arith.cmpi eq, %arg1, %c0_i32_184 : i32
    %356 = arith.extui %355 : i1 to i32
    %c0_i32_185 = arith.constant 0 : i32
    %357 = arith.cmpi ne, %356, %c0_i32_185 : i32
    scf.if %357 {
      %c0_209 = arith.constant 0 : index
      %c0_210 = arith.constant 0 : index
      %381 = vector.load %arg18[%c0_209, %c0_210] : memref<8x32xf32, #tpu.memory_space<vmem>>, vector<8x32xf32>
      %c0_211 = arith.constant 0 : index
      %c0_212 = arith.constant 0 : index
      %382 = vector.load %arg15[%c0_211, %c0_212] : memref<8x32xf32, #tpu.memory_space<vmem>>, vector<8x32xf32>
      tpu.vector_store %arg15[%c0_211, %c0_212], %381 {strides = array<i32>} : memref<8x32xf32, #tpu.memory_space<vmem>>, vector<8x32xf32>,
      %c0_213 = arith.constant 0 : index
      %c0_214 = arith.constant 0 : index
      %383 = vector.load %arg19[%c0_213, %c0_214] : memref<8x32xf32, #tpu.memory_space<vmem>>, vector<8x32xf32>
      %c0_215 = arith.constant 0 : index
      %c0_216 = arith.constant 0 : index
      %384 = vector.load %arg16[%c0_215, %c0_216] : memref<8x32xf32, #tpu.memory_space<vmem>>, vector<8x32xf32>
      tpu.vector_store %arg16[%c0_215, %c0_216], %383 {strides = array<i32>} : memref<8x32xf32, #tpu.memory_space<vmem>>, vector<8x32xf32>,
    } else {
    }
    %c0_186 = arith.constant 0 : index
    %c0_187 = arith.constant 0 : index
    %c0_188 = arith.constant 0 : index
    %358 = vector.load %arg14[%c0_186, %c0_187, %c0_188] : memref<8x8x32xf32, #tpu.memory_space<vmem>>, vector<8x8x32xf32>
    %359 = vector.shape_cast %358 : vector<8x8x32xf32> to vector<64x32xf32>
    %c0_189 = arith.constant 0 : index
    %c0_190 = arith.constant 0 : index
    %360 = vector.load %arg8[%c0_189, %c0_190] : memref<32x128xf32, #tpu.memory_space<vmem>>, vector<32x128xf32>
    %cst_191 = arith.constant dense<0.000000e+00> : vector<64x128xf32>
    %361 = tpu.matmul %359, %360, %cst_191 {dimension_numbers = #tpu.dot_dimension_numbers<[1], [0], [0], [1], [0, 0, 1, 1], [], []>} : vector<64x32xf32>, vector<32x128xf32>, vector<64x128xf32> -> vector<64x128xf32>
    %c0_192 = arith.constant 0 : index
    %c0_193 = arith.constant 0 : index
    %362 = vector.load %arg9[%c0_192, %c0_193] : memref<1x128xf32, #tpu.memory_space<vmem>>, vector<1x128xf32>
    %363 = vector.broadcast %362 : vector<1x128xf32> to vector<64x128xf32>
    %364 = arith.addf %361, %363 : vector<64x128xf32>
    %cst_194 = arith.constant 0.000000e+00 : f32
    %365 = vector.broadcast %cst_194 : f32 to vector<64x128xf32>
    %366 = arith.maximumf %364, %365 : vector<64x128xf32>
    %c0_195 = arith.constant 0 : index
    %c0_196 = arith.constant 0 : index
    %367 = vector.load %arg10[%c0_195, %c0_196] : memref<128x128xf32, #tpu.memory_space<vmem>>, vector<128x128xf32>
    %cst_197 = arith.constant dense<0.000000e+00> : vector<64x128xf32>
    %368 = tpu.matmul %366, %367, %cst_197 {dimension_numbers = #tpu.dot_dimension_numbers<[1], [0], [0], [1], [0, 0, 1, 1], [], []>} : vector<64x128xf32>, vector<128x128xf32>, vector<64x128xf32> -> vector<64x128xf32>
    %c0_198 = arith.constant 0 : index
    %c0_199 = arith.constant 0 : index
    %369 = vector.load %arg11[%c0_198, %c0_199] : memref<1x128xf32, #tpu.memory_space<vmem>>, vector<1x128xf32>
    %370 = vector.broadcast %369 : vector<1x128xf32> to vector<64x128xf32>
    %371 = arith.addf %368, %370 : vector<64x128xf32>
    %cst_200 = arith.constant 0.000000e+00 : f32
    %372 = vector.broadcast %cst_200 : f32 to vector<64x128xf32>
    %373 = arith.maximumf %371, %372 : vector<64x128xf32>
    %c0_201 = arith.constant 0 : index
    %c0_202 = arith.constant 0 : index
    %374 = vector.load %arg12[%c0_201, %c0_202] : memref<128x128xf32, #tpu.memory_space<vmem>>, vector<128x128xf32>
    %cst_203 = arith.constant dense<0.000000e+00> : vector<64x128xf32>
    %375 = tpu.matmul %373, %374, %cst_203 {dimension_numbers = #tpu.dot_dimension_numbers<[1], [0], [0], [1], [0, 0, 1, 1], [], []>} : vector<64x128xf32>, vector<128x128xf32>, vector<64x128xf32> -> vector<64x128xf32>
    %c0_204 = arith.constant 0 : index
    %c0_205 = arith.constant 0 : index
    %376 = vector.load %arg13[%c0_204, %c0_205] : memref<1x128xf32, #tpu.memory_space<vmem>>, vector<1x128xf32>
    %377 = vector.broadcast %376 : vector<1x128xf32> to vector<64x128xf32>
    %378 = arith.addf %375, %377 : vector<64x128xf32>
    %379 = vector.shape_cast %378 : vector<64x128xf32> to vector<8x8x128xf32>
    %c0_206 = arith.constant 0 : index
    %c0_207 = arith.constant 0 : index
    %c0_208 = arith.constant 0 : index
    %380 = vector.load %arg17[%c0_206, %c0_207, %c0_208] : memref<8x8x128xf32, #tpu.memory_space<vmem>>, vector<8x8x128xf32>
    tpu.vector_store %arg17[%c0_206, %c0_207, %c0_208], %379 {strides = array<i32>} : memref<8x8x128xf32, #tpu.memory_space<vmem>>, vector<8x8x128xf32>,
    return
  }
  func.func @transform_0(%arg0: i32, %arg1: i32) -> (i32, i32, i32) {
    %c0_i32 = arith.constant 0 : i32
    %c0_i32_0 = arith.constant 0 : i32
    return %arg1, %arg0, %c0_i32 : i32, i32, i32
  }
  func.func @transform_1(%arg0: i32, %arg1: i32) -> (i32, i32) {
    %c0_i32 = arith.constant 0 : i32
    %c0_i32_0 = arith.constant 0 : i32
    return %arg0, %c0_i32 : i32, i32
  }
  func.func @transform_2(%arg0: i32, %arg1: i32) -> (i32, i32) {
    %c0_i32 = arith.constant 0 : i32
    %c0_i32_0 = arith.constant 0 : i32
    return %arg0, %c0_i32 : i32, i32
  }
  func.func @transform_3(%arg0: i32, %arg1: i32) -> (i32, i32) {
    %c0_i32 = arith.constant 0 : i32
    %c0_i32_0 = arith.constant 0 : i32
    %c0_i32_1 = arith.constant 0 : i32
    return %c0_i32, %c0_i32_0 : i32, i32
  }
  func.func @transform_4(%arg0: i32, %arg1: i32) -> (i32, i32) {
    %c0_i32 = arith.constant 0 : i32
    %c0_i32_0 = arith.constant 0 : i32
    %c0_i32_1 = arith.constant 0 : i32
    return %c0_i32, %c0_i32_0 : i32, i32
  }
  func.func @transform_5(%arg0: i32, %arg1: i32) -> (i32, i32) {
    %c0_i32 = arith.constant 0 : i32
    %c0_i32_0 = arith.constant 0 : i32
    %c0_i32_1 = arith.constant 0 : i32
    return %c0_i32, %c0_i32_0 : i32, i32
  }
  func.func @transform_6(%arg0: i32, %arg1: i32) -> (i32, i32) {
    %c0_i32 = arith.constant 0 : i32
    %c0_i32_0 = arith.constant 0 : i32
    %c0_i32_1 = arith.constant 0 : i32
    return %c0_i32, %c0_i32_0 : i32, i32
  }
  func.func @transform_7(%arg0: i32, %arg1: i32) -> (i32, i32) {
    %c0_i32 = arith.constant 0 : i32
    %c0_i32_0 = arith.constant 0 : i32
    %c0_i32_1 = arith.constant 0 : i32
    return %c0_i32, %c0_i32_0 : i32, i32
  }
  func.func @transform_8(%arg0: i32, %arg1: i32) -> (i32, i32) {
    %c0_i32 = arith.constant 0 : i32
    %c0_i32_0 = arith.constant 0 : i32
    %c0_i32_1 = arith.constant 0 : i32
    return %c0_i32, %c0_i32_0 : i32, i32
  }
  func.func @transform_9(%arg0: i32, %arg1: i32) -> (i32, i32) {
    %c0_i32 = arith.constant 0 : i32
    %c0_i32_0 = arith.constant 0 : i32
    %c0_i32_1 = arith.constant 0 : i32
    return %c0_i32, %c0_i32_0 : i32, i32
  }
  func.func @transform_10(%arg0: i32, %arg1: i32) -> (i32, i32) {
    %c0_i32 = arith.constant 0 : i32
    %c0_i32_0 = arith.constant 0 : i32
    %c0_i32_1 = arith.constant 0 : i32
    return %c0_i32, %c0_i32_0 : i32, i32
  }
  func.func @transform_11(%arg0: i32, %arg1: i32) -> (i32, i32) {
    %c0_i32 = arith.constant 0 : i32
    %c0_i32_0 = arith.constant 0 : i32
    %c0_i32_1 = arith.constant 0 : i32
    return %c0_i32, %c0_i32_0 : i32, i32
  }
  func.func @transform_12(%arg0: i32, %arg1: i32) -> (i32, i32, i32) {
    %c0_i32 = arith.constant 0 : i32
    %c0_i32_0 = arith.constant 0 : i32
    return %arg1, %arg0, %c0_i32 : i32, i32, i32
  }
  func.func @transform_13(%arg0: i32, %arg1: i32) -> (i32, i32) {
    %c0_i32 = arith.constant 0 : i32
    %c0_i32_0 = arith.constant 0 : i32
    return %arg0, %c0_i32 : i32, i32
  }
  func.func @transform_14(%arg0: i32, %arg1: i32) -> (i32, i32) {
    %c0_i32 = arith.constant 0 : i32
    %c0_i32_0 = arith.constant 0 : i32
    return %arg0, %c0_i32 : i32, i32
  }
  func.func @transform_15(%arg0: i32, %arg1: i32) -> (i32, i32, i32) {
    %c0_i32 = arith.constant 0 : i32
    %c0_i32_0 = arith.constant 0 : i32
    return %arg1, %arg0, %c0_i32 : i32, i32, i32
  }
}

</mosaic_0001>

<bundles_post_ra>
// kernel: tpu_custom_call.1
= control target key start
LH: loop header
LB: loop body
LE: loop exit
PB: predicated region body
PF: predicated region fallthrough
CT: control target
= control target key end

     0   :  { %21 = vsyncpa [#allocation5], 0  ;;  %s4170_s0 = inlined_call_operand.hbm [shape: f32[8,8,128], index: 0, kind: input, shape index: {}]   ;;  %s4171_s1 = inlined_call_operand.hbm [shape: f32[8,32], index: 1, kind: input, shape index: {}]   ;;  %s4172_s2 = inlined_call_operand.hbm [shape: f32[8,32], index: 2, kind: input, shape index: {}]   ;;  %s4173_s3 = inlined_call_operand.hbm [shape: f32[128,128], index: 3, kind: input, shape index: {}]   ;;  %s4174_s4 = inlined_call_operand.hbm [shape: f32[32,128], index: 4, kind: input, shape index: {}]   ;;  %s4175_s5 = inlined_call_operand.vmem [shape: f32[1,128], index: 5, kind: input, shape index: {}]   ;;  %s4176_s6 = inlined_call_operand.hbm [shape: f32[32,128], index: 6, kind: input, shape index: {}]   ;;  %s4177_s7 = inlined_call_operand.vmem [shape: f32[1,128], index: 7, kind: input, shape index: {}]   ;;  %s4178_s8 = inlined_call_operand.hbm [shape: f32[128,128], index: 8, kind: input, shape index: {}]   ;;  %s4179_s9 = inlined_call_operand.vmem [shape: f32[1,128], index: 9, kind: input, shape index: {}]   ;;  %s4180_s10 = inlined_call_operand.hbm [shape: f32[128,128], index: 10, kind: input, shape index: {}]   ;;  %s4181_s11 = inlined_call_operand.vmem [shape: f32[1,128], index: 11, kind: input, shape index: {}]   ;;  %s4182_s12 = inlined_call_operand.hbm [shape: f32[8,8,32], index: 12, kind: output, shape index: {0}]   ;;  %s4183_s13 = inlined_call_operand.hbm [shape: f32[8,32], index: 13, kind: output, shape index: {1}]   ;;  %s4184_s14 = inlined_call_operand.hbm [shape: f32[8,32], index: 14, kind: output, shape index: {2}]   ;;  %s4185_s15 = inlined_call_operand.hbm [shape: f32[8,8,128], index: 15, kind: output, shape index: {3}]  }
   0x1   :  { %22 = vsyncpa [#allocation8], 0 }
   0x2   :  { %23 = vsyncpa [#allocation11], 0 }
   0x3   :  { %24 = vsyncpa [#allocation14], 0 }
   0x4   :  { %25 = vsyncpa [#allocation17], 0 }
   0x5   :  { %26 = vsyncpa [#allocation6], 0 }
   0x6   :  { %27 = vsyncpa [#allocation20], 0 }
   0x7   :  { %28 = vsyncpa [#allocation23], 0  ;;  %s3466_s18 = smov [#allocation7]  }
   0x8   :  { %s47_s19 = sshll.u32 %s3466_s18, 4  ;;  %s48_s19 = int_to_ptr.vmem [resolvable:$true] %s47_s19 }
   0x9   :  { %s3218_s20 = scalar_lea.vmem %s48_s19, 128  ;;  %p3223_p1 = scmp.lt.s32.totalorder %s48_s19, %s48_s19 }
   0xa   :  { %p3219_p0 = scmp.ne.s32.totalorder %s48_s19, %s3218_s20  ;;  %p3224_p2 = scmp.lt.s32.totalorder %s3218_s20, %s3218_s20 }
   0xc   :  { %p3225_p3 = por %p3224_p2, %p3223_p1 }
   0xe   :  { %p3226_p4 = pnand %p3225_p3, %p3219_p0 }
  0x10   :  { %3229 = shalt.err (!%p3226_p4)
}
  0x11   :  { %50 = dma.hbm_to_vmem [thread:$0]  %s4171_s1, 128, %s48_s19, [#allocation8]  }
  0x12   :  { %s3467_s23 = smov [#allocation10]   ;;  %s3468_s25 = smov [#allocation13]  }
  0x13   :  { %s66_s24 = sshll.u32 %s3467_s23, 4  ;;  %s92_s26 = sshll.u32 %s3468_s25, 4  ;;  %s67_s24 = int_to_ptr.vmem [resolvable:$true] %s66_s24  ;;  %s93_s26 = int_to_ptr.vmem [resolvable:$true] %s92_s26 }
  0x14   :  { %s3238_s27 = scalar_lea.vmem %s67_s24, 2048  ;;  %p3243_p6 = scmp.lt.s32.totalorder %s67_s24, %s67_s24 }
  0x15   :  { %p3239_p5 = scmp.ne.s32.totalorder %s67_s24, %s3238_s27  ;;  %p3244_p7 = scmp.lt.s32.totalorder %s3238_s27, %s3238_s27 }
  0x17   :  { %p3245_p8 = por %p3244_p7, %p3243_p6 }
  0x19   :  { %p3246_p9 = pnand %p3245_p8, %p3239_p5 }
  0x1b   :  { %3249 = shalt.err (!%p3246_p9)
}
  0x1c   :  { %s3469_s28 = smov 128   ;;  %s3470_s29 = smov 8  }
  0x1d   :  { %72 = dma.hbm_to_vmem [thread:$0]  %s4173_s3, 2048, %s67_s24, [#allocation11], %s3469_s28, %s3469_s28, %s3470_s29  }
  0x1e   :  { %s3258_s1 = scalar_lea.vmem %s93_s26, 512  ;;  %p3263_p11 = scmp.lt.s32.totalorder %s93_s26, %s93_s26 }
  0x1f   :  { %p3259_p10 = scmp.ne.s32.totalorder %s93_s26, %s3258_s1  ;;  %p3264_p12 = scmp.lt.s32.totalorder %s3258_s1, %s3258_s1 }
  0x21   :  { %p3265_p13 = por %p3264_p12, %p3263_p11 }
  0x23   :  { %p3266_p0 = pnand %p3265_p13, %p3259_p10 }
  0x25   :  { %3269 = shalt.err (!%p3266_p0)
}
  0x26   :  { %98 = dma.hbm_to_vmem [thread:$0]  %s4176_s6, 512, %s93_s26, [#allocation14], %s3469_s28, %s3469_s28, %s3470_s29  }
  0x27   :  { %s3471_s19 = smov [#allocation4]   ;;  %s3472_s21 = smov [#allocation9]  }
  0x28   :  { %s34_s20 = sshll.u32 %s3471_s19, 4  ;;  %s57_s3 = sshll.u32 %s3472_s21, 4  ;;  %s35_s20 = int_to_ptr.vmem [resolvable:$true] %s34_s20  ;;  %s58_s3 = int_to_ptr.vmem [resolvable:$true] %s57_s3 }
  0x29   :  { %s3278_s22 = scalar_lea.vmem %s35_s20, 1024  ;;  %p3283_p2 = scmp.lt.s32.totalorder %s35_s20, %s35_s20 }
  0x2a   :  { %p3279_p1 = scmp.ne.s32.totalorder %s35_s20, %s3278_s22  ;;  %p3284_p3 = scmp.lt.s32.totalorder %s3278_s22, %s3278_s22 }
  0x2c   :  { %p3285_p4 = por %p3284_p3, %p3283_p2 }
  0x2e   :  { %p3286_p5 = pnand %p3285_p4, %p3279_p1 }
  0x30   :  { %3289 = shalt.err (!%p3286_p5)
}
  0x31   :  { %40 = dma.hbm_to_vmem [thread:$0]  %s4170_s0, 1024, %s35_s20, [#allocation5], %s3469_s28, %s3469_s28, %s3470_s29  }
  0x32   :  { %s3298_s6 = scalar_lea.vmem %s58_s3, 128  ;;  %p3303_p7 = scmp.lt.s32.totalorder %s58_s3, %s58_s3 }
  0x33   :  { %p3299_p6 = scmp.ne.s32.totalorder %s58_s3, %s3298_s6  ;;  %p3304_p8 = scmp.lt.s32.totalorder %s3298_s6, %s3298_s6 }
  0x35   :  { %p3305_p9 = por %p3304_p8, %p3303_p7 }
  0x37   :  { %p3306_p10 = pnand %p3305_p9, %p3299_p6 }
  0x39   :  { %3309 = shalt.err (!%p3306_p10)
}
  0x3a   :  { %60 = dma.hbm_to_vmem [thread:$0]  %s4172_s2, 128, %s58_s3, [#allocation8]  }
  0x3b   :  { %s3473_s27 = smov [#allocation12]   ;;  %s3474_s16 = smov [#allocation15]  }
  0x3c   :  { %s78_s30 = sshll.u32 %s3473_s27, 4  ;;  %s106_s1 = sshll.u32 %s3474_s16, 4  ;;  %s79_s30 = int_to_ptr.vmem [resolvable:$true] %s78_s30  ;;  %s107_s1 = int_to_ptr.vmem [resolvable:$true] %s106_s1 }
  0x3d   :  { %s3318_s17 = scalar_lea.vmem %s79_s30, 512  ;;  %p3323_p12 = scmp.lt.s32.totalorder %s79_s30, %s79_s30 }
  0x3e   :  { %p3319_p11 = scmp.ne.s32.totalorder %s79_s30, %s3318_s17  ;;  %p3324_p13 = scmp.lt.s32.totalorder %s3318_s17, %s3318_s17 }
  0x40   :  { %p3325_p0 = por %p3324_p13, %p3323_p12 }
  0x42   :  { %p3326_p1 = pnand %p3325_p0, %p3319_p11 }
  0x44   :  { %3329 = shalt.err (!%p3326_p1)
}
  0x45   :  { %84 = dma.hbm_to_vmem [thread:$0]  %s4174_s4, 512, %s79_s30, [#allocation11], %s3469_s28, %s3469_s28, %s3470_s29  }
  0x46   :  { %s3338_s2 = scalar_lea.vmem %s107_s1, 2048  ;;  %p3343_p3 = scmp.lt.s32.totalorder %s107_s1, %s107_s1 }
  0x47   :  { %p3339_p2 = scmp.ne.s32.totalorder %s107_s1, %s3338_s2  ;;  %p3344_p4 = scmp.lt.s32.totalorder %s3338_s2, %s3338_s2 }
  0x49   :  { %p3345_p5 = por %p3344_p4, %p3343_p3 }
  0x4b   :  { %p3346_p6 = pnand %p3345_p5, %p3339_p2 }
  0x4d   :  { %3349 = shalt.err (!%p3346_p6)
}
  0x4e   :  { %112 = dma.hbm_to_vmem [thread:$0]  %s4178_s8, 2048, %s107_s1, [#allocation14], %s3469_s28, %s3469_s28, %s3470_s29  }
  0x4f   :  { %s3475_s21 = smov [#allocation16]  }
  0x50   :  { %s120_s3 = sshll.u32 %s3475_s21, 4  ;;  %s121_s3 = int_to_ptr.vmem [resolvable:$true] %s120_s3 }
  0x51   :  { %s3358_s22 = scalar_lea.vmem %s121_s3, 2048  ;;  %p3363_p8 = scmp.lt.s32.totalorder %s121_s3, %s121_s3 }
  0x52   :  { %p3359_p7 = scmp.ne.s32.totalorder %s121_s3, %s3358_s22  ;;  %p3364_p9 = scmp.lt.s32.totalorder %s3358_s22, %s3358_s22 }
  0x54   :  { %p3365_p10 = por %p3364_p9, %p3363_p8 }
  0x56   :  { %p3366_p11 = pnand %p3365_p10, %p3359_p7 }
  0x58   :  { %3369 = shalt.err (!%p3366_p11)
}
  0x59   :  { %126 = dma.hbm_to_vmem [thread:$0]  %s4180_s10, 2048, %s121_s3, [#allocation17], %s3469_s28, %s3469_s28, %s3470_s29  }
  0x5a   :  { %3450 = dma.done.wait [#allocation5], 1024  }
  0x5b   :  { %3451 = vsyncadd [#allocation5], 4294966272 }
  0x5c   :  { %3452 = dma.done.wait [#allocation8], 256  }
  0x5d   :  { %3453 = vsyncadd [#allocation8], 4294967040 }
  0x5e   :  { %3454 = dma.done.wait [#allocation11], 2560  }
  0x5f   :  { %3455 = vsyncadd [#allocation11], 4294964736 }
  0x60   :  { %3456 = dma.done.wait [#allocation14], 2560  }
  0x61   :  { %3457 = vsyncadd [#allocation14], 4294964736 }
  0x62   :  { %3458 = dma.done.wait [#allocation17], 2048  }
  0x63   :  { %3459 = vsyncadd [#allocation17], 4294965248  ;;  %v3476_v0 = vmov 0.0   ;;  %vm3477_vm0 = vmmov 0   ;;  %v3613_v1 = vld [vmem:[#allocation10 + $0x78] sm:$0xff]  ;;  %v3615_v2 = vld [vmem:[#allocation10 + $0x70] sm:$0xff] }
  0x64   :  { %2662 = vmatprep.subr.mxu1 %v3476_v0  ;;  %2651 = vmatprep.subr.mxu0 %v3476_v0  ;;  %v3619_v3 = vld [vmem:[#allocation10 + $0x68] sm:$0xff]  ;;  %v3622_v4 = vld [vmem:[#allocation12 + $0x18] sm:$0xff]  ;;  %v3625_v5 = vld [vmem:[#allocation10 + $0x60] sm:$0xff]  ;;  %vm158_vm1 = vcmask 261120   ;;  %s3478_s24 = smov 64   ;;  %s3479_s6 = smov 32  }
  0x65   :  { %2659 = vmatprep.mubr.msk.f32.mxu0 %vm3477_vm0, %v3476_v0  ;;  %2694 = vmatprep.mubr.msk.f32.mxu1 %vm3477_vm0, %v3476_v0  ;;  %v3628_v6 = vld [vmem:[#allocation12 + $0x10] sm:$0xff]  ;;  %v3632_v7 = vld [vmem:[#allocation12 + $0x8] sm:$0xff]  ;;  %v3635_v8 = vld [vmem:[#allocation10 + $0x58] sm:$0xff]  ;;  %s3480_s25 = smov 96   ;;  %s3482_s0 = smov [#allocation18]  }
  0x66   :  { %2663 = vmatpush3.msra.mxu1 %v3613_v1  ;;  %2652 = vmatpush3.msra.mxu0 %v3622_v4  ;;  %v157_v9 = vld [vmem:[#allocation7] sm:$0xff]  ;;  %v3640_v10 = vld [vmem:[#allocation12] sm:$0xff]  ;;  %v3650_v12 = vld [vmem:[#allocation10 + $0x48] sm:$0xff]  ;;  %s2321_s18 = sshll.u32 %s3482_s0, 4  ;;  %s2322_s18 = int_to_ptr.vmem [resolvable:$true] %s2321_s18 }
  0x67   :  { %2664 = vmatprep.subr.mxu1 %v3476_v0  ;;  %2653 = vmatprep.subr.mxu0 %v3476_v0  ;;  %159 = vst.msk [vmem:[#allocation2] sm:$0xff] %vm158_vm1, %v157_v9  ;;  %v3644_v11 = vld [vmem:[#allocation10 + $0x50] sm:$0xff]  ;;  %v3656_v13 = vld [vmem:[#allocation10 + $0x40] sm:$0xff]  ;;  %v3660_v14 = vld [vmem:[#allocation10 + $0x38] sm:$0xff] }
  0x68   :  { %2665 = vmatpush3.msra.mxu1 %v3615_v2  ;;  %2654 = vmatpush3.msra.mxu0 %v3628_v6  ;;  %v3665_v16 = vld [vmem:[#allocation10 + $0x30] sm:$0xff]  ;;  %v3671_v17 = vld [vmem:[#allocation10 + $0x28] sm:$0xff]  ;;  %v3677_v18 = vld [vmem:[#allocation10 + $0x20] sm:$0xff] }
  0x69   :  { %2666 = vmatprep.subr.mxu1 %v3476_v0  ;;  %2655 = vmatprep.subr.mxu0 %v3476_v0  ;;  %v3683_v19 = vld [vmem:[#allocation10 + $0x18] sm:$0xff]  ;;  %v3690_v20 = vld [vmem:[#allocation10 + $0x10] sm:$0xff]  ;;  %v3695_v21 = vld [vmem:[#allocation10 + $0x8] sm:$0xff] }
  0x6a   :  { %2667 = vmatpush3.msra.mxu1 %v3619_v3  ;;  %2656 = vmatpush3.msra.mxu0 %v3632_v7  ;;  %v3699_v22 = vld [vmem:[#allocation10] sm:$0xff]  ;;  %v164_v23 = vld [vmem:[#allocation4] sm:$0xff]  ;;  %v160_v24 = vld [vmem:[#allocation9] sm:$0xff] }
  0x6b   :  { %2668 = vmatprep.subr.mxu1 %v3476_v0  ;;  %2657 = vmatprep.subr.mxu0 %v3476_v0  ;;  %161 = vst.msk [vmem:[#allocation3] sm:$0xff] %vm158_vm1, %v160_v24  ;;  %v3719_v28 = vld [vmem:[%s4175_s5] ss:$0 sm:$0xff]  ;;  %v379_v51 = vld [vmem:[#allocation4 + $0x8] sm:$0xff] }
  0x6c   :  { %2669 = vmatpush3.msra.mxu1 %v3625_v5  ;;  %2658 = vmatpush3.msra.mxu0 %v3640_v10 }
  0x6d   :  { %2670 = vmatprep.subr.mxu1 %v3476_v0  ;;  %2697 = vmatprep.subr.mxu0 %v3476_v0 }
  0x6e   :  { %2671 = vmatpush3.msra.mxu1 %v3635_v8  ;;  %v162_v15 = vld [vmem:[#allocation2] sm:$0xff] }
  0x6f   :  { %2672 = vmatprep.subr.mxu1 %v3476_v0  ;;  %2660 = vmatmul.mubr.msk.f32.vlgmr.msra.gmra.mxu0 %vm158_vm1, %v162_v15 }
  0x70   :  { %2673 = vmatpush3.msra.mxu1 %v3644_v11  ;;  %2698 = vmatpush3.msra.mxu0 %v3622_v4 }
  0x71   :  { %2674 = vmatprep.subr.mxu1 %v3476_v0  ;;  %2699 = vmatprep.subr.mxu0 %v3476_v0 }
  0x72   :  { %2675 = vmatpush3.msra.mxu1 %v3650_v12  ;;  %2700 = vmatpush3.msra.mxu0 %v3628_v6  ;;  %v163_v33 = vld [vmem:[#allocation3] sm:$0xff] }
  0x73   :  { %2676 = vmatprep.subr.mxu1 %v3476_v0  ;;  %2701 = vmatprep.subr.mxu0 %v3476_v0 }
  0x74   :  { %2677 = vmatpush3.msra.mxu1 %v3656_v13  ;;  %2702 = vmatpush3.msra.mxu0 %v3632_v7 }
  0x75   :  { %2678 = vmatprep.subr.mxu1 %v3476_v0  ;;  %2703 = vmatprep.subr.mxu0 %v3476_v0 }
  0x76   :  { %2679 = vmatpush3.msra.mxu1 %v3660_v14  ;;  %2704 = vmatpush3.msra.mxu0 %v3640_v10 }
  0x77   :  { %2680 = vmatprep.subr.mxu1 %v3476_v0  ;;  %2705 = vmatprep.mubr.msk.f32.mxu0 %vm3477_vm0, %v3476_v0 }
  0x78   :  { %2681 = vmatpush3.msra.mxu1 %v3665_v16  ;;  %2708 = vmatprep.subr.mxu0 %v3476_v0 }
  0x79   :  { %2682 = vmatprep.subr.mxu1 %v3476_v0 }
  0x7a   :  { %2683 = vmatpush3.msra.mxu1 %v3671_v17 }
  0x7b   :  { %2684 = vmatprep.subr.mxu1 %v3476_v0 }
  0x7c   :  { %2685 = vmatpush3.msra.mxu1 %v3677_v18 }
  0x7d   :  { %2686 = vmatprep.subr.mxu1 %v3476_v0 }
  0x7e   :  { %2687 = vmatpush3.msra.mxu1 %v3683_v19 }
  0x7f   :  { %2688 = vmatprep.subr.mxu1 %v3476_v0 }
  0x80   :  { %2689 = vmatpush3.msra.mxu1 %v3690_v20 }
  0x81   :  { %2690 = vmatprep.subr.mxu1 %v3476_v0 }
  0x82   :  { %2691 = vmatpush3.msra.mxu1 %v3695_v21 }
  0x83   :  { %2692 = vmatprep.subr.mxu1 %v3476_v0 }
  0x84   :  { %2693 = vmatpush3.msra.mxu1 %v3699_v22 }
  0x85   :  { %2695 = vmatmul.mubr.f32.vlgmr.msra.gmra.mxu1 %v164_v23  ;;  %2743 = vmatprep.subr.mxu1 %v3476_v0 }
  0x86   :  { %2744 = vmatpush3.msra.mxu1 %v3622_v4  ;;  %2751 = vmatprep.mubr.msk.f32.mxu1 %vm3477_vm0, %v3476_v0 }
  0x87   :  { %2745 = vmatprep.subr.mxu1 %v3476_v0 }
  0x88   :  { %2746 = vmatpush3.msra.mxu1 %v3628_v6 }
  0x89   :  { %2747 = vmatprep.subr.mxu1 %v3476_v0 }
  0x8a   :  { %2748 = vmatpush3.msra.mxu1 %v3632_v7 }
  0x8b   :  { %2749 = vmatprep.subr.mxu1 %v3476_v0 }
  0x8c   :  { %2750 = vmatpush3.msra.mxu1 %v3640_v10 }
  0x8d   :  { %2754 = vmatprep.subr.mxu1 %v3476_v0 }
 0x12f   :  { %v255_v25 = vpop.f32.mrf.mxu0 }
 0x131   :  { %v2661_v26 = vpop.f32.mrf.mxu0 }
 0x145   :  { %v325_v27 = vpop.f32.mrf.mxu1 }
 0x146   :  { %v326_v29 = vadd.f32 %v325_v27, %v255_v25 }
 0x147   :  { %v2696_v30 = vpop.f32.mrf.mxu1 }
 0x148   :  { %v336_v31 = vadd.f32 %v3719_v28, %v326_v29 }
 0x14a   :  { %3146 = vtanh.f32 %v336_v31  ;;  %v2382_v34 = vmul.f32 -1.442695, %v336_v31 }
 0x14c   :  { %3148 = vpow2.f32 %v2382_v34  ;;  %v594_v34 = vld [vmem:[#allocation4 + $0x10] sm:$0xff] }
 0x157   :  { %v3147_v32 = vpop.eup %3146 }
 0x158   :  { %350 = vrot.lane.b32.xlu0 %v3147_v32, %s3478_s24 }
 0x159   :  { %v3149_v35 = vpop.eup %3148 }
 0x15a   :  { %v340_v36 = vadd.f32 1.0, %v3149_v35 }
 0x15c   :  { %345 = vrot.lane.b32.xlu0 %v163_v33, %s3479_s6  ;;  %3150 = vrcp.f32 %v340_v36 }
 0x169   :  { %v3151_v37 = vpop.eup %3150 }
 0x1ca   :  { %v351_v38 = vpop.permute.xlu0 %350 }
 0x1cb   :  { %v353_v39 = vmul.f32 %v3151_v37, %v351_v38 }
 0x1cd   :  { %355 = vrot.lane.b32.xlu1 %v353_v39, %s3479_s6 }
 0x1ce   :  { %v346_v40 = vpop.permute.xlu0 %345 }
 0x1cf   :  { %v348_v41 = vmul.f32 %v3151_v37, %v346_v40 }
 0x23f   :  { %v356_v42 = vpop.permute.xlu1 %355 }
 0x240   :  { %v358_v43 = vadd.f32 %v356_v42, %v348_v41 }
 0x242   :  { %3152 = vtanh.f32 %v358_v43 }
 0x24f   :  { %v3153_v44 = vpop.eup %3152 }
 0x250   :  { %361 = vrot.lane.b32.xlu1 %v3153_v44, %s3478_s24 }
 0x254   :  { %371 = vrot.lane.b32.xlu1 %v358_v43, %s3480_s25 }
 0x2c2   :  { %v362_v45 = vpop.permute.xlu1 %361 }
 0x2c3   :  { %v364_v46 = vmul.f32 %v3151_v37, %v362_v45 }
 0x2c5   :  { %366 = vrot.lane.b32.xlu0 %v364_v46, %s3479_s6 }
 0x2c6   :  { %v372_v47 = vpop.permute.xlu1 %371 }
 0x2c7   :  { %374 = vst.msk [vmem:[#allocation3] sm:$0xff] %vm158_vm1, %v372_v47 }
 0x2ce   :  { %v377_v48 = vld [vmem:[#allocation3] sm:$0xff] }
 0x2cf   :  { %559 = vrot.lane.b32.xlu1 %v377_v48, %s3479_s6 }
 0x337   :  { %v367_v49 = vpop.permute.xlu0 %366 }
 0x338   :  { %369 = vst.msk [vmem:[#allocation2] sm:$0xff] %vm158_vm1, %v367_v49  ;;  %375 = vst.msk [vmem:[#allocation18] sm:$0xff] %vm158_vm1, %v367_v49 }
 0x33f   :  { %v376_v50 = vld [vmem:[#allocation2] sm:$0xff] }
 0x340   :  { %2706 = vmatmul.mubr.msk.f32.vlgmr.msra.gmra.mxu0 %vm158_vm1, %v376_v50 }
 0x341   :  { %2709 = vmatpush3.msra.mxu0 %v3613_v1  ;;  %2740 = vmatprep.mubr.msk.f32.mxu0 %vm3477_vm0, %v3476_v0  ;;  %v560_v15 = vpop.permute.xlu1 %559 }
 0x342   :  { %2710 = vmatprep.subr.mxu0 %v3476_v0 }
 0x343   :  { %2711 = vmatpush3.msra.mxu0 %v3615_v2 }
 0x344   :  { %2712 = vmatprep.subr.mxu0 %v3476_v0 }
 0x345   :  { %2713 = vmatpush3.msra.mxu0 %v3619_v3 }
 0x346   :  { %2714 = vmatprep.subr.mxu0 %v3476_v0 }
 0x347   :  { %2715 = vmatpush3.msra.mxu0 %v3625_v5 }
 0x348   :  { %2716 = vmatprep.subr.mxu0 %v3476_v0 }
 0x349   :  { %2717 = vmatpush3.msra.mxu0 %v3635_v8 }
 0x34a   :  { %2718 = vmatprep.subr.mxu0 %v3476_v0 }
 0x34b   :  { %2719 = vmatpush3.msra.mxu0 %v3644_v11 }
 0x34c   :  { %2720 = vmatprep.subr.mxu0 %v3476_v0 }
 0x34d   :  { %2721 = vmatpush3.msra.mxu0 %v3650_v12 }
 0x34e   :  { %2722 = vmatprep.subr.mxu0 %v3476_v0 }
 0x34f   :  { %2723 = vmatpush3.msra.mxu0 %v3656_v13 }
 0x350   :  { %2724 = vmatprep.subr.mxu0 %v3476_v0 }
 0x351   :  { %2725 = vmatpush3.msra.mxu0 %v3660_v14 }
 0x352   :  { %2726 = vmatprep.subr.mxu0 %v3476_v0 }
 0x353   :  { %2727 = vmatpush3.msra.mxu0 %v3665_v16 }
 0x354   :  { %2728 = vmatprep.subr.mxu0 %v3476_v0 }
 0x355   :  { %2729 = vmatpush3.msra.mxu0 %v3671_v17 }
 0x356   :  { %2730 = vmatprep.subr.mxu0 %v3476_v0 }
 0x357   :  { %2731 = vmatpush3.msra.mxu0 %v3677_v18 }
 0x358   :  { %2732 = vmatprep.subr.mxu0 %v3476_v0 }
 0x359   :  { %2733 = vmatpush3.msra.mxu0 %v3683_v19 }
 0x35a   :  { %2734 = vmatprep.subr.mxu0 %v3476_v0 }
 0x35b   :  { %2735 = vmatpush3.msra.mxu0 %v3690_v20 }
 0x35c   :  { %2736 = vmatprep.subr.mxu0 %v3476_v0 }
 0x35d   :  { %2737 = vmatpush3.msra.mxu0 %v3695_v21 }
 0x35e   :  { %2738 = vmatprep.subr.mxu0 %v3476_v0 }
 0x35f   :  { %2739 = vmatpush3.msra.mxu0 %v3699_v22 }
 0x360   :  { %2741 = vmatmul.mubr.f32.vlgmr.msra.gmra.mxu0 %v379_v51  ;;  %2789 = vmatprep.subr.mxu0 %v3476_v0 }
 0x361   :  { %2790 = vmatpush3.msra.mxu0 %v3622_v4  ;;  %2797 = vmatprep.mubr.msk.f32.mxu0 %vm3477_vm0, %v3476_v0 }
 0x362   :  { %2791 = vmatprep.subr.mxu0 %v3476_v0 }
 0x363   :  { %2792 = vmatpush3.msra.mxu0 %v3628_v6 }
 0x364   :  { %2793 = vmatprep.subr.mxu0 %v3476_v0 }
 0x365   :  { %2794 = vmatpush3.msra.mxu0 %v3632_v7 }
 0x366   :  { %2795 = vmatprep.subr.mxu0 %v3476_v0 }
 0x367   :  { %2796 = vmatpush3.msra.mxu0 %v3640_v10 }
 0x368   :  { %2800 = vmatprep.subr.mxu0 %v3476_v0 }
 0x400   :  { %v469_v52 = vpop.f32.mrf.mxu0 }
 0x402   :  { %v2707_v53 = vpop.f32.mrf.mxu0 }
 0x420   :  { %v539_v54 = vpop.f32.mrf.mxu0 }
 0x421   :  { %v540_v55 = vadd.f32 %v539_v54, %v469_v52 }
 0x422   :  { %v2742_v56 = vpop.f32.mrf.mxu0 }
 0x423   :  { %v550_v57 = vadd.f32 %v3719_v28, %v540_v55 }
 0x425   :  { %3154 = vtanh.f32 %v550_v57  ;;  %v2385_v59 = vmul.f32 -1.442695, %v550_v57 }
 0x427   :  { %3156 = vpow2.f32 %v2385_v59  ;;  %v809_v59 = vld [vmem:[#allocation4 + $0x18] sm:$0xff] }
 0x432   :  { %v3155_v58 = vpop.eup %3154 }
 0x433   :  { %564 = vrot.lane.b32.xlu0 %v3155_v58, %s3478_s24 }
 0x434   :  { %v3157_v60 = vpop.eup %3156 }
 0x435   :  { %v554_v61 = vadd.f32 1.0, %v3157_v60 }
 0x437   :  { %3158 = vrcp.f32 %v554_v61 }
 0x444   :  { %v3159_v62 = vpop.eup %3158 }
 0x445   :  { %v562_v23 = vmul.f32 %v3159_v62, %v560_v15 }
 0x4a5   :  { %v565_v63 = vpop.permute.xlu0 %564 }
 0x4a6   :  { %v567_v9 = vmul.f32 %v3159_v62, %v565_v63 }
 0x4a8   :  { %569 = vrot.lane.b32.xlu0 %v567_v9, %s3479_s6 }
 0x51a   :  { %v570_v24 = vpop.permute.xlu0 %569 }
 0x51b   :  { %v572_v25 = vadd.f32 %v570_v24, %v562_v23 }
 0x51d   :  { %3160 = vtanh.f32 %v572_v25 }
 0x52a   :  { %v3161_v26 = vpop.eup %3160 }
 0x52b   :  { %575 = vrot.lane.b32.xlu1 %v3161_v26, %s3478_s24 }
 0x52f   :  { %585 = vrot.lane.b32.xlu1 %v572_v25, %s3480_s25 }
 0x59d   :  { %v576_v27 = vpop.permute.xlu1 %575 }
 0x59e   :  { %v578_v29 = vmul.f32 %v3159_v62, %v576_v27 }
 0x5a0   :  { %580 = vrot.lane.b32.xlu0 %v578_v29, %s3479_s6 }
 0x5a1   :  { %v586_v30 = vpop.permute.xlu1 %585 }
 0x5a2   :  { %588 = vst.msk [vmem:[#allocation3] sm:$0xff] %vm158_vm1, %v586_v30 }
 0x5a9   :  { %v592_v31 = vld [vmem:[#allocation3] sm:$0xff] }
 0x5aa   :  { %774 = vrot.lane.b32.xlu1 %v592_v31, %s3479_s6 }
 0x612   :  { %v581_v32 = vpop.permute.xlu0 %580 }
 0x613   :  { %583 = vst.msk [vmem:[#allocation2] sm:$0xff] %vm158_vm1, %v581_v32  ;;  %590 = vst.msk [vmem:[#allocation18 + $0x8] sm:$0xff] %vm158_vm1, %v581_v32 }
 0x61a   :  { %v591_v33 = vld [vmem:[#allocation2] sm:$0xff] }
 0x61b   :  { %2752 = vmatmul.mubr.msk.f32.vlgmr.msra.gmra.mxu1 %vm158_vm1, %v591_v33 }
 0x61c   :  { %2755 = vmatpush3.msra.mxu1 %v3613_v1  ;;  %2786 = vmatprep.mubr.msk.f32.mxu1 %vm3477_vm0, %v3476_v0  ;;  %v775_v48 = vpop.permute.xlu1 %774 }
 0x61d   :  { %2756 = vmatprep.subr.mxu1 %v3476_v0 }
 0x61e   :  { %2757 = vmatpush3.msra.mxu1 %v3615_v2 }
 0x61f   :  { %2758 = vmatprep.subr.mxu1 %v3476_v0 }
 0x620   :  { %2759 = vmatpush3.msra.mxu1 %v3619_v3 }
 0x621   :  { %2760 = vmatprep.subr.mxu1 %v3476_v0 }
 0x622   :  { %2761 = vmatpush3.msra.mxu1 %v3625_v5 }
 0x623   :  { %2762 = vmatprep.subr.mxu1 %v3476_v0 }
 0x624   :  { %2763 = vmatpush3.msra.mxu1 %v3635_v8 }
 0x625   :  { %2764 = vmatprep.subr.mxu1 %v3476_v0 }
 0x626   :  { %2765 = vmatpush3.msra.mxu1 %v3644_v11 }
 0x627   :  { %2766 = vmatprep.subr.mxu1 %v3476_v0 }
 0x628   :  { %2767 = vmatpush3.msra.mxu1 %v3650_v12 }
 0x629   :  { %2768 = vmatprep.subr.mxu1 %v3476_v0 }
 0x62a   :  { %2769 = vmatpush3.msra.mxu1 %v3656_v13 }
 0x62b   :  { %2770 = vmatprep.subr.mxu1 %v3476_v0 }
 0x62c   :  { %2771 = vmatpush3.msra.mxu1 %v3660_v14 }
 0x62d   :  { %2772 = vmatprep.subr.mxu1 %v3476_v0 }
 0x62e   :  { %2773 = vmatpush3.msra.mxu1 %v3665_v16 }
 0x62f   :  { %2774 = vmatprep.subr.mxu1 %v3476_v0 }
 0x630   :  { %2775 = vmatpush3.msra.mxu1 %v3671_v17 }
 0x631   :  { %2776 = vmatprep.subr.mxu1 %v3476_v0 }
 0x632   :  { %2777 = vmatpush3.msra.mxu1 %v3677_v18 }
 0x633   :  { %2778 = vmatprep.subr.mxu1 %v3476_v0 }
 0x634   :  { %2779 = vmatpush3.msra.mxu1 %v3683_v19 }
 0x635   :  { %2780 = vmatprep.subr.mxu1 %v3476_v0 }
 0x636   :  { %2781 = vmatpush3.msra.mxu1 %v3690_v20 }
 0x637   :  { %2782 = vmatprep.subr.mxu1 %v3476_v0 }
 0x638   :  { %2783 = vmatpush3.msra.mxu1 %v3695_v21 }
 0x639   :  { %2784 = vmatprep.subr.mxu1 %v3476_v0 }
 0x63a   :  { %2785 = vmatpush3.msra.mxu1 %v3699_v22 }
 0x63b   :  { %2787 = vmatmul.mubr.f32.vlgmr.msra.gmra.mxu1 %v594_v34  ;;  %2835 = vmatprep.subr.mxu1 %v3476_v0 }
 0x63c   :  { %2836 = vmatpush3.msra.mxu1 %v3622_v4  ;;  %2843 = vmatprep.mubr.msk.f32.mxu1 %vm3477_vm0, %v3476_v0 }
 0x63d   :  { %2837 = vmatprep.subr.mxu1 %v3476_v0 }
 0x63e   :  { %2838 = vmatpush3.msra.mxu1 %v3628_v6 }
 0x63f   :  { %2839 = vmatprep.subr.mxu1 %v3476_v0 }
 0x640   :  { %2840 = vmatpush3.msra.mxu1 %v3632_v7 }
 0x641   :  { %2841 = vmatprep.subr.mxu1 %v3476_v0 }
 0x642   :  { %2842 = vmatpush3.msra.mxu1 %v3640_v10 }
 0x643   :  { %2846 = vmatprep.subr.mxu1 %v3476_v0 }
 0x6db   :  { %v684_v35 = vpop.f32.mrf.mxu1 }
 0x6dd   :  { %v2753_v36 = vpop.f32.mrf.mxu1 }
 0x6fb   :  { %v754_v37 = vpop.f32.mrf.mxu1 }
 0x6fc   :  { %v755_v38 = vadd.f32 %v754_v37, %v684_v35 }
 0x6fd   :  { %v2788_v39 = vpop.f32.mrf.mxu1 }
 0x6fe   :  { %v765_v40 = vadd.f32 %v3719_v28, %v755_v38 }
 0x700   :  { %3162 = vtanh.f32 %v765_v40  ;;  %v2388_v42 = vmul.f32 -1.442695, %v765_v40 }
 0x702   :  { %3164 = vpow2.f32 %v2388_v42 }
 0x70d   :  { %v3163_v41 = vpop.eup %3162 }
 0x70e   :  { %779 = vrot.lane.b32.xlu0 %v3163_v41, %s3478_s24 }
 0x70f   :  { %v3165_v43 = vpop.eup %3164 }
 0x710   :  { %v769_v44 = vadd.f32 1.0, %v3165_v43 }
 0x712   :  { %3166 = vrcp.f32 %v769_v44 }
 0x71f   :  { %v3167_v45 = vpop.eup %3166 }
 0x720   :  { %v777_v49 = vmul.f32 %v3167_v45, %v775_v48  ;;  %v3944_v48 = vld [vmem:[#allocation10 + $0x78] sm:$0xff] }
 0x780   :  { %v780_v46 = vpop.permute.xlu0 %779 }
 0x781   :  { %v782_v47 = vmul.f32 %v3167_v45, %v780_v46 }
 0x783   :  { %784 = vrot.lane.b32.xlu0 %v782_v47, %s3479_s6 }
 0x7f5   :  { %v785_v50 = vpop.permute.xlu0 %784 }
 0x7f6   :  { %v787_v51 = vadd.f32 %v785_v50, %v777_v49  ;;  %v3947_v50 = vld [vmem:[#allocation10 + $0x70] sm:$0xff] }
 0x7f8   :  { %3168 = vtanh.f32 %v787_v51 }
 0x805   :  { %v3169_v52 = vpop.eup %3168 }
 0x806   :  { %790 = vrot.lane.b32.xlu1 %v3169_v52, %s3478_s24  ;;  %v3957_v52 = vld [vmem:[#allocation10 + $0x60] sm:$0xff] }
 0x80a   :  { %800 = vrot.lane.b32.xlu1 %v787_v51, %s3480_s25  ;;  %v3953_v51 = vld [vmem:[#allocation10 + $0x68] sm:$0xff] }
 0x878   :  { %v791_v53 = vpop.permute.xlu1 %790 }
 0x879   :  { %v793_v54 = vmul.f32 %v3167_v45, %v791_v53  ;;  %v3961_v53 = vld [vmem:[#allocation10 + $0x58] sm:$0xff] }
 0x87b   :  { %795 = vrot.lane.b32.xlu0 %v793_v54, %s3479_s6  ;;  %v3965_v54 = vld [vmem:[#allocation10 + $0x50] sm:$0xff] }
 0x87c   :  { %v801_v55 = vpop.permute.xlu1 %800 }
 0x87d   :  { %803 = vst.msk [vmem:[#allocation3] sm:$0xff] %vm158_vm1, %v801_v55  ;;  %v3969_v55 = vld [vmem:[#allocation10 + $0x48] sm:$0xff] }
 0x884   :  { %v807_v56 = vld [vmem:[#allocation3] sm:$0xff] }
 0x885   :  { %989 = vrot.lane.b32.xlu1 %v807_v56, %s3479_s6  ;;  %v3973_v56 = vld [vmem:[#allocation10 + $0x40] sm:$0xff] }
 0x8ed   :  { %v796_v57 = vpop.permute.xlu0 %795 }
 0x8ee   :  { %798 = vst.msk [vmem:[#allocation2] sm:$0xff] %vm158_vm1, %v796_v57  ;;  %805 = vst.msk [vmem:[#allocation18 + $0x10] sm:$0xff] %vm158_vm1, %v796_v57  ;;  %v3977_v57 = vld [vmem:[#allocation10 + $0x38] sm:$0xff] }
 0x8f5   :  { %v806_v58 = vld [vmem:[#allocation2] sm:$0xff] }
 0x8f6   :  { %2798 = vmatmul.mubr.msk.f32.vlgmr.msra.gmra.mxu0 %vm158_vm1, %v806_v58  ;;  %v3981_v58 = vld [vmem:[#allocation10 + $0x30] sm:$0xff] }
 0x8f7   :  { %2801 = vmatpush3.msra.mxu0 %v3613_v1  ;;  %2832 = vmatprep.mubr.msk.f32.mxu0 %vm3477_vm0, %v3476_v0  ;;  %v990_v26 = vpop.permute.xlu1 %989 }
 0x8f8   :  { %2802 = vmatprep.subr.mxu0 %v3476_v0 }
 0x8f9   :  { %2803 = vmatpush3.msra.mxu0 %v3615_v2 }
 0x8fa   :  { %2804 = vmatprep.subr.mxu0 %v3476_v0 }
 0x8fb   :  { %2805 = vmatpush3.msra.mxu0 %v3619_v3 }
 0x8fc   :  { %2806 = vmatprep.subr.mxu0 %v3476_v0 }
 0x8fd   :  { %2807 = vmatpush3.msra.mxu0 %v3625_v5 }
 0x8fe   :  { %2808 = vmatprep.subr.mxu0 %v3476_v0 }
 0x8ff   :  { %2809 = vmatpush3.msra.mxu0 %v3635_v8 }
 0x900   :  { %2810 = vmatprep.subr.mxu0 %v3476_v0 }
 0x901   :  { %2811 = vmatpush3.msra.mxu0 %v3644_v11 }
 0x902   :  { %2812 = vmatprep.subr.mxu0 %v3476_v0 }
 0x903   :  { %2813 = vmatpush3.msra.mxu0 %v3650_v12 }
 0x904   :  { %2814 = vmatprep.subr.mxu0 %v3476_v0 }
 0x905   :  { %2815 = vmatpush3.msra.mxu0 %v3656_v13 }
 0x906   :  { %2816 = vmatprep.subr.mxu0 %v3476_v0 }
 0x907   :  { %2817 = vmatpush3.msra.mxu0 %v3660_v14 }
 0x908   :  { %2818 = vmatprep.subr.mxu0 %v3476_v0 }
 0x909   :  { %2819 = vmatpush3.msra.mxu0 %v3665_v16 }
 0x90a   :  { %2820 = vmatprep.subr.mxu0 %v3476_v0 }
 0x90b   :  { %2821 = vmatpush3.msra.mxu0 %v3671_v17 }
 0x90c   :  { %2822 = vmatprep.subr.mxu0 %v3476_v0 }
 0x90d   :  { %2823 = vmatpush3.msra.mxu0 %v3677_v18 }
 0x90e   :  { %2824 = vmatprep.subr.mxu0 %v3476_v0 }
 0x90f   :  { %2825 = vmatpush3.msra.mxu0 %v3683_v19 }
 0x910   :  { %2826 = vmatprep.subr.mxu0 %v3476_v0 }
 0x911   :  { %2827 = vmatpush3.msra.mxu0 %v3690_v20 }
 0x912   :  { %2828 = vmatprep.subr.mxu0 %v3476_v0 }
 0x913   :  { %2829 = vmatpush3.msra.mxu0 %v3695_v21 }
 0x914   :  { %2830 = vmatprep.subr.mxu0 %v3476_v0 }
 0x915   :  { %2831 = vmatpush3.msra.mxu0 %v3699_v22 }
 0x916   :  { %2833 = vmatmul.mubr.f32.vlgmr.msra.gmra.mxu0 %v809_v59  ;;  %2881 = vmatprep.subr.mxu0 %v3476_v0  ;;  %v3985_v59 = vld [vmem:[#allocation10 + $0x28] sm:$0xff] }
 0x917   :  { %2882 = vmatpush3.msra.mxu0 %v3622_v4  ;;  %2889 = vmatprep.mubr.msk.f32.mxu0 %vm3477_vm0, %v3476_v0 }
 0x918   :  { %2883 = vmatprep.subr.mxu0 %v3476_v0 }
 0x919   :  { %2884 = vmatpush3.msra.mxu0 %v3628_v6 }
 0x91a   :  { %2885 = vmatprep.subr.mxu0 %v3476_v0 }
 0x91b   :  { %2886 = vmatpush3.msra.mxu0 %v3632_v7 }
 0x91c   :  { %2887 = vmatprep.subr.mxu0 %v3476_v0 }
 0x91d   :  { %2888 = vmatpush3.msra.mxu0 %v3640_v10 }
 0x91e   :  { %2892 = vmatprep.subr.mxu0 %v3476_v0 }
 0x9b6   :  { %v899_v60 = vpop.f32.mrf.mxu0 }
 0x9b8   :  { %v2799_v61 = vpop.f32.mrf.mxu0 }
 0x9b9   :  { %v3993_v61 = vld [vmem:[#allocation10 + $0x18] sm:$0xff] }
 0x9d6   :  { %v969_v4 = vpop.f32.mrf.mxu0 }
 0x9d7   :  { %v970_v62 = vadd.f32 %v969_v4, %v899_v60  ;;  %v3989_v60 = vld [vmem:[#allocation10 + $0x20] sm:$0xff]  ;;  %v3997_v4 = vld [vmem:[#allocation10 + $0x10] sm:$0xff] }
 0x9d8   :  { %v2834_v63 = vpop.f32.mrf.mxu0 }
 0x9d9   :  { %v980_v9 = vadd.f32 %v3719_v28, %v970_v62  ;;  %v1239_v62 = vld [vmem:[#allocation4 + $0x28] sm:$0xff] }
 0x9db   :  { %3170 = vtanh.f32 %v980_v9  ;;  %v2391_v6 = vmul.f32 -1.442695, %v980_v9 }
 0x9dd   :  { %3172 = vpow2.f32 %v2391_v6 }
 0x9e8   :  { %v3171_v15 = vpop.eup %3170 }
 0x9e9   :  { %994 = vrot.lane.b32.xlu0 %v3171_v15, %s3478_s24 }
 0x9ea   :  { %v3173_v7 = vpop.eup %3172 }
 0x9eb   :  { %v984_v23 = vadd.f32 1.0, %v3173_v7 }
 0x9ed   :  { %3174 = vrcp.f32 %v984_v23 }
 0x9fa   :  { %v3175_v24 = vpop.eup %3174 }
 0x9fb   :  { %v992_v27 = vmul.f32 %v3175_v24, %v990_v26 }
 0xa5b   :  { %v995_v10 = vpop.permute.xlu0 %994 }
 0xa5c   :  { %v997_v25 = vmul.f32 %v3175_v24, %v995_v10 }
 0xa5e   :  { %999 = vrot.lane.b32.xlu0 %v997_v25, %s3479_s6 }
 0xad0   :  { %v1000_v29 = vpop.permute.xlu0 %999 }
 0xad1   :  { %v1002_v30 = vadd.f32 %v1000_v29, %v992_v27 }
 0xad3   :  { %3176 = vtanh.f32 %v1002_v30 }
 0xae0   :  { %v3177_v31 = vpop.eup %3176 }
 0xae1   :  { %1005 = vrot.lane.b32.xlu1 %v3177_v31, %s3478_s24 }
 0xae5   :  { %1015 = vrot.lane.b32.xlu1 %v1002_v30, %s3480_s25 }
 0xb53   :  { %v1006_v32 = vpop.permute.xlu1 %1005 }
 0xb54   :  { %v1008_v33 = vmul.f32 %v3175_v24, %v1006_v32 }
 0xb56   :  { %1010 = vrot.lane.b32.xlu0 %v1008_v33, %s3479_s6  ;;  %v1474_v33 = vld [vmem:[#allocation12 + $0x18] sm:$0xff] }
 0xb57   :  { %v1016_v34 = vpop.permute.xlu1 %1015 }
 0xb58   :  { %1018 = vst.msk [vmem:[#allocation3] sm:$0xff] %vm158_vm1, %v1016_v34  ;;  %v1473_v34 = vld [vmem:[#allocation12 + $0x10] sm:$0xff] }
 0xb5f   :  { %v1022_v35 = vld [vmem:[#allocation3] sm:$0xff] }
 0xb60   :  { %1204 = vrot.lane.b32.xlu1 %v1022_v35, %s3479_s6  ;;  %v1472_v35 = vld [vmem:[#allocation12 + $0x8] sm:$0xff] }
 0xbc8   :  { %v1011_v36 = vpop.permute.xlu0 %1010 }
 0xbc9   :  { %1013 = vst.msk [vmem:[#allocation2] sm:$0xff] %vm158_vm1, %v1011_v36  ;;  %1020 = vst.msk [vmem:[#allocation18 + $0x18] sm:$0xff] %vm158_vm1, %v1011_v36  ;;  %v1471_v36 = vld [vmem:[#allocation12] sm:$0xff] }
 0xbd0   :  { %v1021_v37 = vld [vmem:[#allocation2] sm:$0xff] }
 0xbd1   :  { %2844 = vmatmul.mubr.msk.f32.vlgmr.msra.gmra.mxu1 %vm158_vm1, %v1021_v37 }
 0xbd2   :  { %2847 = vmatpush3.msra.mxu1 %v3613_v1  ;;  %2878 = vmatprep.mubr.msk.f32.mxu1 %vm3477_vm0, %v3476_v0  ;;  %v1024_v1 = vld [vmem:[#allocation4 + $0x20] sm:$0xff]  ;;  %v1205_v38 = vpop.permute.xlu1 %1204 }
 0xbd3   :  { %2848 = vmatprep.subr.mxu1 %v3476_v0 }
 0xbd4   :  { %2849 = vmatpush3.msra.mxu1 %v3615_v2 }
 0xbd5   :  { %2850 = vmatprep.subr.mxu1 %v3476_v0 }
 0xbd6   :  { %2851 = vmatpush3.msra.mxu1 %v3619_v3 }
 0xbd7   :  { %2852 = vmatprep.subr.mxu1 %v3476_v0 }
 0xbd8   :  { %2853 = vmatpush3.msra.mxu1 %v3625_v5 }
 0xbd9   :  { %2854 = vmatprep.subr.mxu1 %v3476_v0 }
 0xbda   :  { %2855 = vmatpush3.msra.mxu1 %v3635_v8 }
 0xbdb   :  { %2856 = vmatprep.subr.mxu1 %v3476_v0 }
 0xbdc   :  { %2857 = vmatpush3.msra.mxu1 %v3644_v11 }
 0xbdd   :  { %2858 = vmatprep.subr.mxu1 %v3476_v0 }
 0xbde   :  { %2859 = vmatpush3.msra.mxu1 %v3650_v12 }
 0xbdf   :  { %2860 = vmatprep.subr.mxu1 %v3476_v0 }
 0xbe0   :  { %2861 = vmatpush3.msra.mxu1 %v3656_v13 }
 0xbe1   :  { %2862 = vmatprep.subr.mxu1 %v3476_v0 }
 0xbe2   :  { %2863 = vmatpush3.msra.mxu1 %v3660_v14 }
 0xbe3   :  { %2864 = vmatprep.subr.mxu1 %v3476_v0 }
 0xbe4   :  { %2865 = vmatpush3.msra.mxu1 %v3665_v16 }
 0xbe5   :  { %2866 = vmatprep.subr.mxu1 %v3476_v0 }
 0xbe6   :  { %2867 = vmatpush3.msra.mxu1 %v3671_v17 }
 0xbe7   :  { %2868 = vmatprep.subr.mxu1 %v3476_v0 }
 0xbe8   :  { %2869 = vmatpush3.msra.mxu1 %v3677_v18 }
 0xbe9   :  { %2870 = vmatprep.subr.mxu1 %v3476_v0 }
 0xbea   :  { %2871 = vmatpush3.msra.mxu1 %v3683_v19 }
 0xbeb   :  { %2872 = vmatprep.subr.mxu1 %v3476_v0 }
 0xbec   :  { %2873 = vmatpush3.msra.mxu1 %v3690_v20 }
 0xbed   :  { %2874 = vmatprep.subr.mxu1 %v3476_v0 }
 0xbee   :  { %2875 = vmatpush3.msra.mxu1 %v3695_v21 }
 0xbef   :  { %2876 = vmatprep.subr.mxu1 %v3476_v0 }
 0xbf0   :  { %2877 = vmatpush3.msra.mxu1 %v3699_v22 }
 0xbf1   :  { %2879 = vmatmul.mubr.f32.vlgmr.msra.gmra.mxu1 %v1024_v1  ;;  %2927 = vmatprep.subr.mxu1 %v3476_v0 }
 0xbf2   :  { %2935 = vmatprep.mubr.msk.f32.mxu1 %vm3477_vm0, %v3476_v0  ;;  %2928 = vmatpush3.msra.mxu1 %v1474_v33 }
 0xbf3   :  { %2929 = vmatprep.subr.mxu1 %v3476_v0 }
 0xbf4   :  { %2930 = vmatpush3.msra.mxu1 %v1473_v34 }
 0xbf5   :  { %2931 = vmatprep.subr.mxu1 %v3476_v0 }
 0xbf6   :  { %2932 = vmatpush3.msra.mxu1 %v1472_v35 }
 0xbf7   :  { %2933 = vmatprep.subr.mxu1 %v3476_v0 }
 0xbf8   :  { %2934 = vmatpush3.msra.mxu1 %v1471_v36 }
 0xbf9   :  { %2938 = vmatprep.subr.mxu1 %v3476_v0 }
 0xc91   :  { %v1114_v2 = vpop.f32.mrf.mxu1 }
 0xc93   :  { %v2845_v3 = vpop.f32.mrf.mxu1 }
 0xcb1   :  { %v1184_v5 = vpop.f32.mrf.mxu1 }
 0xcb2   :  { %v1185_v8 = vadd.f32 %v1184_v5, %v1114_v2 }
 0xcb3   :  { %v2880_v11 = vpop.f32.mrf.mxu1 }
 0xcb4   :  { %v1195_v12 = vadd.f32 %v3719_v28, %v1185_v8  ;;  %v4056_v11 = vld [vmem:[#allocation10 + $0x8] sm:$0xff] }
 0xcb6   :  { %3178 = vtanh.f32 %v1195_v12  ;;  %v2394_v14 = vmul.f32 -1.442695, %v1195_v12  ;;  %v4060_v12 = vld [vmem:[#allocation10] sm:$0xff] }
 0xcb8   :  { %3180 = vpow2.f32 %v2394_v14  ;;  %v1899_v14 = vld [vmem:[#allocation13 + $0x18] sm:$0xff] }
 0xcc3   :  { %v3179_v13 = vpop.eup %3178 }
 0xcc4   :  { %1209 = vrot.lane.b32.xlu0 %v3179_v13, %s3478_s24  ;;  %v1454_v13 = vld [vmem:[#allocation4 + $0x30] sm:$0xff] }
 0xcc5   :  { %v3181_v16 = vpop.eup %3180 }
 0xcc6   :  { %v1199_v17 = vadd.f32 1.0, %v3181_v16  ;;  %v1898_v16 = vld [vmem:[#allocation13 + $0x10] sm:$0xff] }
 0xcc8   :  { %3182 = vrcp.f32 %v1199_v17  ;;  %v1888_v17 = vld [vmem:[#allocation18] sm:$0xff] }
 0xcd5   :  { %v3183_v18 = vpop.eup %3182 }
 0xcd6   :  { %v1207_v39 = vmul.f32 %v3183_v18, %v1205_v38  ;;  %v1890_v38 = vld [vmem:[#allocation18 + $0x10] sm:$0xff] }
 0xd36   :  { %v1210_v19 = vpop.permute.xlu0 %1209 }
 0xd37   :  { %v1212_v20 = vmul.f32 %v3183_v18, %v1210_v19  ;;  %v1896_v19 = vld [vmem:[#allocation13] sm:$0xff] }
 0xd39   :  { %1214 = vrot.lane.b32.xlu0 %v1212_v20, %s3479_s6  ;;  %v1889_v20 = vld [vmem:[#allocation18 + $0x8] sm:$0xff] }
 0xdab   :  { %v1215_v40 = vpop.permute.xlu0 %1214 }
 0xdac   :  { %v1217_v41 = vadd.f32 %v1215_v40, %v1207_v39  ;;  %v1891_v39 = vld [vmem:[#allocation18 + $0x18] sm:$0xff] }
 0xdae   :  { %3184 = vtanh.f32 %v1217_v41 }
 0xdbb   :  { %v3185_v42 = vpop.eup %3184 }
 0xdbc   :  { %1220 = vrot.lane.b32.xlu1 %v3185_v42, %s3478_s24 }
 0xdc0   :  { %1230 = vrot.lane.b32.xlu1 %v1217_v41, %s3480_s25 }
 0xe2e   :  { %v1221_v43 = vpop.permute.xlu1 %1220 }
 0xe2f   :  { %v1223_v44 = vmul.f32 %v3183_v18, %v1221_v43  ;;  %v1897_v18 = vld [vmem:[#allocation13 + $0x8] sm:$0xff] }
 0xe31   :  { %1225 = vrot.lane.b32.xlu0 %v1223_v44, %s3479_s6 }
 0xe32   :  { %v1231_v45 = vpop.permute.xlu1 %1230 }
 0xe33   :  { %1233 = vst.msk [vmem:[#allocation3] sm:$0xff] %vm158_vm1, %v1231_v45  ;;  %v4074_v45 = vld [vmem:[%s4175_s5] ss:$0 sm:$0xff] }
 0xe3a   :  { %v1237_v46 = vld [vmem:[#allocation3] sm:$0xff] }
 0xe3b   :  { %1419 = vrot.lane.b32.xlu1 %v1237_v46, %s3479_s6 }
 0xea3   :  { %v1226_v47 = vpop.permute.xlu0 %1225 }
 0xea4   :  { %1228 = vst.msk [vmem:[#allocation2] sm:$0xff] %vm158_vm1, %v1226_v47  ;;  %1235 = vst.msk [vmem:[#allocation18 + $0x20] sm:$0xff] %vm158_vm1, %v1226_v47 }
 0xeab   :  { %v1236_v49 = vld [vmem:[#allocation2] sm:$0xff] }
 0xeac   :  { %2890 = vmatmul.mubr.msk.f32.vlgmr.msra.gmra.mxu0 %vm158_vm1, %v1236_v49  ;;  %v1892_v40 = vld [vmem:[#allocation18 + $0x20] sm:$0xff] }
 0xead   :  { %2893 = vmatpush3.msra.mxu0 %v3944_v48  ;;  %2924 = vmatprep.mubr.msk.f32.mxu0 %vm3477_vm0, %v3476_v0  ;;  %v1420_v29 = vpop.permute.xlu1 %1419 }
 0xeae   :  { %2894 = vmatprep.subr.mxu0 %v3476_v0 }
 0xeaf   :  { %2895 = vmatpush3.msra.mxu0 %v3947_v50 }
 0xeb0   :  { %2896 = vmatprep.subr.mxu0 %v3476_v0 }
 0xeb1   :  { %2897 = vmatpush3.msra.mxu0 %v3953_v51 }
 0xeb2   :  { %2898 = vmatprep.subr.mxu0 %v3476_v0 }
 0xeb3   :  { %2899 = vmatpush3.msra.mxu0 %v3957_v52 }
 0xeb4   :  { %2900 = vmatprep.subr.mxu0 %v3476_v0 }
 0xeb5   :  { %2901 = vmatpush3.msra.mxu0 %v3961_v53 }
 0xeb6   :  { %2902 = vmatprep.subr.mxu0 %v3476_v0 }
 0xeb7   :  { %2903 = vmatpush3.msra.mxu0 %v3965_v54 }
 0xeb8   :  { %2904 = vmatprep.subr.mxu0 %v3476_v0 }
 0xeb9   :  { %2905 = vmatpush3.msra.mxu0 %v3969_v55 }
 0xeba   :  { %2906 = vmatprep.subr.mxu0 %v3476_v0 }
 0xebb   :  { %2907 = vmatpush3.msra.mxu0 %v3973_v56 }
 0xebc   :  { %2908 = vmatprep.subr.mxu0 %v3476_v0 }
 0xebd   :  { %2909 = vmatpush3.msra.mxu0 %v3977_v57 }
 0xebe   :  { %2910 = vmatprep.subr.mxu0 %v3476_v0 }
 0xebf   :  { %2911 = vmatpush3.msra.mxu0 %v3981_v58 }
 0xec0   :  { %2912 = vmatprep.subr.mxu0 %v3476_v0 }
 0xec1   :  { %2913 = vmatpush3.msra.mxu0 %v3985_v59 }
 0xec2   :  { %2914 = vmatprep.subr.mxu0 %v3476_v0 }
 0xec3   :  { %2915 = vmatpush3.msra.mxu0 %v3989_v60 }
 0xec4   :  { %2916 = vmatprep.subr.mxu0 %v3476_v0 }
 0xec5   :  { %2917 = vmatpush3.msra.mxu0 %v3993_v61 }
 0xec6   :  { %2918 = vmatprep.subr.mxu0 %v3476_v0 }
 0xec7   :  { %2919 = vmatpush3.msra.mxu0 %v3997_v4 }
 0xec8   :  { %2920 = vmatprep.subr.mxu0 %v3476_v0 }
 0xec9   :  { %2921 = vmatpush3.msra.mxu0 %v3695_v21 }
 0xeca   :  { %2922 = vmatprep.subr.mxu0 %v3476_v0 }
 0xecb   :  { %2923 = vmatpush3.msra.mxu0 %v3699_v22 }
 0xecc   :  { %2925 = vmatmul.mubr.f32.vlgmr.msra.gmra.mxu0 %v1239_v62  ;;  %2973 = vmatprep.subr.mxu0 %v3476_v0 }
 0xecd   :  { %2981 = vmatprep.mubr.msk.f32.mxu0 %vm3477_vm0, %v3476_v0  ;;  %2974 = vmatpush3.msra.mxu0 %v1474_v33 }
 0xece   :  { %2975 = vmatprep.subr.mxu0 %v3476_v0 }
 0xecf   :  { %2976 = vmatpush3.msra.mxu0 %v1473_v34 }
 0xed0   :  { %2977 = vmatprep.subr.mxu0 %v3476_v0 }
 0xed1   :  { %2978 = vmatpush3.msra.mxu0 %v1472_v35 }
 0xed2   :  { %2979 = vmatprep.subr.mxu0 %v3476_v0 }
 0xed3   :  { %2980 = vmatpush3.msra.mxu0 %v1471_v36  ;;  %v2059_v36 = vld [vmem:[#allocation15 + $0x78] sm:$0xff] }
 0xed4   :  { %2984 = vmatprep.subr.mxu0 %v3476_v0 }
 0xf6c   :  { %v1329_v63 = vpop.f32.mrf.mxu0 }
 0xf6e   :  { %v2891_v9 = vpop.f32.mrf.mxu0 }
 0xf8c   :  { %v1399_v15 = vpop.f32.mrf.mxu0 }
 0xf8d   :  { %v1400_v6 = vadd.f32 %v1399_v15, %v1329_v63 }
 0xf8e   :  { %v2926_v7 = vpop.f32.mrf.mxu0 }
 0xf8f   :  { %v1410_v23 = vadd.f32 %v3719_v28, %v1400_v6 }
 0xf91   :  { %3186 = vtanh.f32 %v1410_v23  ;;  %v2397_v24 = vmul.f32 -1.442695, %v1410_v23 }
 0xf93   :  { %3188 = vpow2.f32 %v2397_v24 }
 0xf9e   :  { %v3187_v21 = vpop.eup %3186 }
 0xf9f   :  { %1424 = vrot.lane.b32.xlu0 %v3187_v21, %s3478_s24 }
 0xfa0   :  { %v3189_v22 = vpop.eup %3188 }
 0xfa1   :  { %v1414_v10 = vadd.f32 1.0, %v3189_v22 }
 0xfa3   :  { %3190 = vrcp.f32 %v1414_v10 }
 0xfb0   :  { %v3191_v25 = vpop.eup %3190 }
 0xfb1   :  { %v1422_v30 = vmul.f32 %v3191_v25, %v1420_v29 }
0x1011   :  { %v1425_v26 = vpop.permute.xlu0 %1424 }
0x1012   :  { %v1427_v27 = vmul.f32 %v3191_v25, %v1425_v26 }
0x1014   :  { %1429 = vrot.lane.b32.xlu0 %v1427_v27, %s3479_s6 }
0x1086   :  { %v1430_v31 = vpop.permute.xlu0 %1429 }
0x1087   :  { %v1432_v32 = vadd.f32 %v1430_v31, %v1422_v30 }
0x1089   :  { %3192 = vtanh.f32 %v1432_v32 }
0x1096   :  { %v3193_v28 = vpop.eup %3192 }
0x1097   :  { %1435 = vrot.lane.b32.xlu1 %v3193_v28, %s3478_s24 }
0x109b   :  { %1445 = vrot.lane.b32.xlu1 %v1432_v32, %s3480_s25 }
0x1109   :  { %v1436_v37 = vpop.permute.xlu1 %1435 }
0x110a   :  { %v1438_v1 = vmul.f32 %v3191_v25, %v1436_v37  ;;  %v2058_v37 = vld [vmem:[#allocation15 + $0x70] sm:$0xff] }
0x110c   :  { %1440 = vrot.lane.b32.xlu0 %v1438_v1, %s3479_s6  ;;  %v2057_v1 = vld [vmem:[#allocation15 + $0x68] sm:$0xff] }
0x110d   :  { %v1446_v2 = vpop.permute.xlu1 %1445 }
0x110e   :  { %1448 = vst.msk [vmem:[#allocation3] sm:$0xff] %vm158_vm1, %v1446_v2  ;;  %v2056_v2 = vld [vmem:[#allocation15 + $0x60] sm:$0xff] }
0x1115   :  { %v1452_v3 = vld [vmem:[#allocation3] sm:$0xff] }
0x1116   :  { %1634 = vrot.lane.b32.xlu1 %v1452_v3, %s3479_s6  ;;  %v2055_v3 = vld [vmem:[#allocation15 + $0x58] sm:$0xff] }
0x117e   :  { %v1441_v5 = vpop.permute.xlu0 %1440 }
0x117f   :  { %1443 = vst.msk [vmem:[#allocation2] sm:$0xff] %vm158_vm1, %v1441_v5  ;;  %1450 = vst.msk [vmem:[#allocation18 + $0x28] sm:$0xff] %vm158_vm1, %v1441_v5 }
0x1186   :  { %v1451_v8 = vld [vmem:[#allocation2] sm:$0xff]  ;;  %v1893_v41 = vld [vmem:[#allocation18 + $0x28] sm:$0xff] }
0x1187   :  { %2936 = vmatmul.mubr.msk.f32.vlgmr.msra.gmra.mxu1 %vm158_vm1, %v1451_v8  ;;  %v2054_v8 = vld [vmem:[#allocation15 + $0x50] sm:$0xff] }
0x1188   :  { %2939 = vmatpush3.msra.mxu1 %v3944_v48  ;;  %2970 = vmatprep.mubr.msk.f32.mxu1 %vm3477_vm0, %v3476_v0  ;;  %v1635_v21 = vpop.permute.xlu1 %1634 }
0x1189   :  { %2940 = vmatprep.subr.mxu1 %v3476_v0 }
0x118a   :  { %2941 = vmatpush3.msra.mxu1 %v3947_v50 }
0x118b   :  { %2942 = vmatprep.subr.mxu1 %v3476_v0 }
0x118c   :  { %2943 = vmatpush3.msra.mxu1 %v3953_v51 }
0x118d   :  { %2944 = vmatprep.subr.mxu1 %v3476_v0 }
0x118e   :  { %2945 = vmatpush3.msra.mxu1 %v3957_v52 }
0x118f   :  { %2946 = vmatprep.subr.mxu1 %v3476_v0 }
0x1190   :  { %2947 = vmatpush3.msra.mxu1 %v3961_v53 }
0x1191   :  { %2948 = vmatprep.subr.mxu1 %v3476_v0 }
0x1192   :  { %2949 = vmatpush3.msra.mxu1 %v3965_v54 }
0x1193   :  { %2950 = vmatprep.subr.mxu1 %v3476_v0 }
0x1194   :  { %2951 = vmatpush3.msra.mxu1 %v3969_v55 }
0x1195   :  { %2952 = vmatprep.subr.mxu1 %v3476_v0 }
0x1196   :  { %2953 = vmatpush3.msra.mxu1 %v3973_v56 }
0x1197   :  { %2954 = vmatprep.subr.mxu1 %v3476_v0 }
0x1198   :  { %2955 = vmatpush3.msra.mxu1 %v3977_v57 }
0x1199   :  { %2956 = vmatprep.subr.mxu1 %v3476_v0 }
0x119a   :  { %2957 = vmatpush3.msra.mxu1 %v3981_v58 }
0x119b   :  { %2958 = vmatprep.subr.mxu1 %v3476_v0 }
0x119c   :  { %2959 = vmatpush3.msra.mxu1 %v3985_v59 }
0x119d   :  { %2960 = vmatprep.subr.mxu1 %v3476_v0 }
0x119e   :  { %2961 = vmatpush3.msra.mxu1 %v3989_v60 }
0x119f   :  { %2962 = vmatprep.subr.mxu1 %v3476_v0 }
0x11a0   :  { %2963 = vmatpush3.msra.mxu1 %v3993_v61 }
0x11a1   :  { %2964 = vmatprep.subr.mxu1 %v3476_v0 }
0x11a2   :  { %2965 = vmatpush3.msra.mxu1 %v3997_v4 }
0x11a3   :  { %2966 = vmatprep.subr.mxu1 %v3476_v0 }
0x11a4   :  { %2967 = vmatpush3.msra.mxu1 %v4056_v11 }
0x11a5   :  { %2968 = vmatprep.subr.mxu1 %v3476_v0 }
0x11a6   :  { %2969 = vmatpush3.msra.mxu1 %v4060_v12 }
0x11a7   :  { %2971 = vmatmul.mubr.f32.vlgmr.msra.gmra.mxu1 %v1454_v13  ;;  %3019 = vmatprep.subr.mxu1 %v1899_v14  ;;  %v2051_v13 = vld [vmem:[#allocation15 + $0x38] sm:$0xff] }
0x11a8   :  { %3020 = vmatpush3.msra.mxu1 %v1899_v14  ;;  %3027 = vmatprep.mubr.msk.f32.mxu1 %vm158_vm1, %v1888_v17  ;;  %v2050_v14 = vld [vmem:[#allocation15 + $0x30] sm:$0xff]  ;;  %v2048_v17 = vld [vmem:[#allocation15 + $0x20] sm:$0xff] }
0x11a9   :  { %3021 = vmatprep.subr.mxu1 %v1898_v16 }
0x11aa   :  { %3022 = vmatpush3.msra.mxu1 %v1898_v16  ;;  %v2049_v16 = vld [vmem:[#allocation15 + $0x28] sm:$0xff] }
0x11ab   :  { %3023 = vmatprep.subr.mxu1 %v1897_v18 }
0x11ac   :  { %3024 = vmatpush3.msra.mxu1 %v1897_v18  ;;  %v2047_v18 = vld [vmem:[#allocation15 + $0x18] sm:$0xff] }
0x11ad   :  { %3025 = vmatprep.subr.mxu1 %v1896_v19 }
0x11ae   :  { %3026 = vmatpush3.msra.mxu1 %v1896_v19  ;;  %v2046_v19 = vld [vmem:[#allocation15 + $0x10] sm:$0xff] }
0x11af   :  { %3028 = vmatmul.mubr.msk.f32.vlgmr.msra.gmra.mxu1 %vm158_vm1, %v1889_v20  ;;  %3039 = vmatprep.subr.mxu1 %v2059_v36  ;;  %v2045_v20 = vld [vmem:[#allocation15 + $0x8] sm:$0xff] }
0x11b0   :  { %3030 = vmatprep.mubr.msk.f32.mxu1 %vm158_vm1, %v1890_v38  ;;  %3040 = vmatpush3.msra.mxu1 %v2059_v36  ;;  %v2044_v38 = vld [vmem:[#allocation15] sm:$0xff] }
0x11b1   :  { %3041 = vmatprep.subr.mxu1 %v2058_v37 }
0x11b2   :  { %3042 = vmatpush3.msra.mxu1 %v2058_v37 }
0x11b3   :  { %3031 = vmatmul.mubr.msk.f32.gmra.mxu1 %vm158_vm1, %v1891_v39  ;;  %3043 = vmatprep.subr.mxu1 %v2057_v1 }
0x11b4   :  { %3033 = vmatprep.mubr.msk.f32.mxu1 %vm158_vm1, %v1892_v40  ;;  %3044 = vmatpush3.msra.mxu1 %v2057_v1 }
0x11b5   :  { %3045 = vmatprep.subr.mxu1 %v2056_v2 }
0x11b6   :  { %3046 = vmatpush3.msra.mxu1 %v2056_v2 }
0x11b7   :  { %3034 = vmatmul.mubr.msk.f32.gmra.mxu1 %vm158_vm1, %v1893_v41  ;;  %3047 = vmatprep.subr.mxu1 %v2055_v3 }
0x11b8   :  { %3048 = vmatpush3.msra.mxu1 %v2055_v3 }
0x11b9   :  { %3049 = vmatprep.subr.mxu1 %v2054_v8 }
0x11ba   :  { %3050 = vmatpush3.msra.mxu1 %v2054_v8 }
0x1247   :  { %v1544_v42 = vpop.f32.mrf.mxu1 }
0x1249   :  { %v2937_v43 = vpop.f32.mrf.mxu1 }
0x124a   :  { %v2194_v43 = vld [vmem:[#allocation16 + $0x70] sm:$0xff] }
0x1267   :  { %v1614_v44 = vpop.f32.mrf.mxu1 }
0x1268   :  { %v1615_v46 = vadd.f32 %v1614_v44, %v1544_v42  ;;  %v2195_v42 = vld [vmem:[#allocation16 + $0x78] sm:$0xff]  ;;  %v2193_v44 = vld [vmem:[#allocation16 + $0x68] sm:$0xff] }
0x1269   :  { %v2972_v47 = vpop.f32.mrf.mxu1 }
0x126a   :  { %v1625_v49 = vadd.f32 %v4074_v45, %v1615_v46  ;;  %v2192_v46 = vld [vmem:[#allocation16 + $0x60] sm:$0xff]  ;;  %v2191_v47 = vld [vmem:[#allocation16 + $0x58] sm:$0xff] }
0x126c   :  { %3194 = vtanh.f32 %v1625_v49  ;;  %v2400_v63 = vmul.f32 -1.442695, %v1625_v49  ;;  %v2190_v49 = vld [vmem:[#allocation16 + $0x50] sm:$0xff] }
0x126e   :  { %3196 = vpow2.f32 %v2400_v63  ;;  %v2188_v63 = vld [vmem:[#allocation16 + $0x40] sm:$0xff] }
0x1279   :  { %v3195_v62 = vpop.eup %3194 }
0x127a   :  { %1639 = vrot.lane.b32.xlu0 %v3195_v62, %s3478_s24  ;;  %v2189_v62 = vld [vmem:[#allocation16 + $0x48] sm:$0xff] }
0x127b   :  { %v3197_v9 = vpop.eup %3196 }
0x127c   :  { %v1629_v15 = vadd.f32 1.0, %v3197_v9  ;;  %v2187_v9 = vld [vmem:[#allocation16 + $0x38] sm:$0xff] }
0x127e   :  { %3198 = vrcp.f32 %v1629_v15  ;;  %v2186_v15 = vld [vmem:[#allocation16 + $0x30] sm:$0xff] }
0x128b   :  { %v3199_v6 = vpop.eup %3198 }
0x128c   :  { %v1637_v24 = vmul.f32 %v3199_v6, %v1635_v21 }
0x12ec   :  { %v1640_v7 = vpop.permute.xlu0 %1639 }
0x12ed   :  { %v1642_v23 = vmul.f32 %v3199_v6, %v1640_v7 }
0x12ef   :  { %1644 = vrot.lane.b32.xlu0 %v1642_v23, %s3479_s6 }
0x1361   :  { %v1645_v22 = vpop.permute.xlu0 %1644 }
0x1362   :  { %v1647_v10 = vadd.f32 %v1645_v22, %v1637_v24  ;;  %v2404_v22 = vld [vmem:[%s4177_s7] ss:$0 sm:$0xff] }
0x1364   :  { %3200 = vtanh.f32 %v1647_v10 }
0x1371   :  { %v3201_v25 = vpop.eup %3200 }
0x1372   :  { %1650 = vrot.lane.b32.xlu1 %v3201_v25, %s3478_s24 }
0x1376   :  { %1660 = vrot.lane.b32.xlu1 %v1647_v10, %s3480_s25 }
0x13e4   :  { %v1651_v26 = vpop.permute.xlu1 %1650 }
0x13e5   :  { %v1653_v27 = vmul.f32 %v3199_v6, %v1651_v26  ;;  %v3029_v6 = vpop.f32.mrf.mxu1 }
0x13e6   :  { %v2003_v26 = vadd.f32 %v3029_v6, %v2404_v22 }
0x13e7   :  { %1655 = vrot.lane.b32.xlu0 %v1653_v27, %s3479_s6  ;;  %v1997_v7 = vpop.f32.mrf.mxu1 }
0x13e8   :  { %v1661_v29 = vpop.permute.xlu1 %1660  ;;  %v1998_v10 = vadd.f32 %v2404_v22, %v1997_v7 }
0x13e9   :  { %1663 = vst.msk [vmem:[#allocation3] sm:$0xff] %vm158_vm1, %v1661_v29  ;;  %v3032_v23 = vpop.f32.mrf.mxu1 }
0x13ea   :  { %v2036_v27 = vmax.f32 %v1998_v10, 0.0 }
0x13eb   :  { %v2007_v24 = vpop.f32.mrf.mxu1 }
0x13ec   :  { %v2008_v29 = vadd.f32 %v2404_v22, %v2007_v24 }
0x13ed   :  { %v3035_v25 = vpop.f32.mrf.mxu1 }
0x13f0   :  { %v1667_v30 = vld [vmem:[#allocation3] sm:$0xff] }
0x13f1   :  { %1849 = vrot.lane.b32.xlu1 %v1667_v30, %s3479_s6 }
0x1459   :  { %v1656_v31 = vpop.permute.xlu0 %1655 }
0x145a   :  { %1658 = vst.msk [vmem:[#allocation2] sm:$0xff] %vm158_vm1, %v1656_v31  ;;  %1665 = vst.msk [vmem:[#allocation18 + $0x30] sm:$0xff] %vm158_vm1, %v1656_v31 }
0x1461   :  { %v1666_v32 = vld [vmem:[#allocation2] sm:$0xff]  ;;  %v1894_v28 = vld [vmem:[#allocation18 + $0x30] sm:$0xff] }
0x1462   :  { %2982 = vmatmul.mubr.msk.f32.vlgmr.msra.gmra.mxu0 %vm158_vm1, %v1666_v32  ;;  %3036 = vmatprep.mubr.msk.f32.mxu1 %vm158_vm1, %v1894_v28  ;;  %v2017_v32 = vpop.f32.mrf.mxu1  ;;  %v2037_v28 = vmax.f32 %v2003_v26, 0.0 }
0x1463   :  { %2985 = vmatpush3.msra.mxu0 %v3944_v48  ;;  %3016 = vmatprep.mubr.msk.f32.mxu0 %vm3477_vm0, %v3476_v0  ;;  %v1669_v48 = vld [vmem:[#allocation4 + $0x38] sm:$0xff] }
0x1464   :  { %2986 = vmatprep.subr.mxu0 %v3476_v0 }
0x1465   :  { %2987 = vmatpush3.msra.mxu0 %v3947_v50 }
0x1466   :  { %2988 = vmatprep.subr.mxu0 %v3476_v0 }
0x1467   :  { %2989 = vmatpush3.msra.mxu0 %v3953_v51 }
0x1468   :  { %2990 = vmatprep.subr.mxu0 %v3476_v0 }
0x1469   :  { %2991 = vmatpush3.msra.mxu0 %v3957_v52 }
0x146a   :  { %2992 = vmatprep.subr.mxu0 %v3476_v0 }
0x146b   :  { %2993 = vmatpush3.msra.mxu0 %v3961_v53 }
0x146c   :  { %2994 = vmatprep.subr.mxu0 %v3476_v0 }
0x146d   :  { %2995 = vmatpush3.msra.mxu0 %v3965_v54 }
0x146e   :  { %2996 = vmatprep.subr.mxu0 %v3476_v0 }
0x146f   :  { %2997 = vmatpush3.msra.mxu0 %v3969_v55 }
0x1470   :  { %2998 = vmatprep.subr.mxu0 %v3476_v0 }
0x1471   :  { %2999 = vmatpush3.msra.mxu0 %v3973_v56 }
0x1472   :  { %3000 = vmatprep.subr.mxu0 %v3476_v0 }
0x1473   :  { %3001 = vmatpush3.msra.mxu0 %v3977_v57 }
0x1474   :  { %3002 = vmatprep.subr.mxu0 %v3476_v0 }
0x1475   :  { %3003 = vmatpush3.msra.mxu0 %v3981_v58 }
0x1476   :  { %3004 = vmatprep.subr.mxu0 %v3476_v0 }
0x1477   :  { %3005 = vmatpush3.msra.mxu0 %v3985_v59 }
0x1478   :  { %3006 = vmatprep.subr.mxu0 %v3476_v0 }
0x1479   :  { %3007 = vmatpush3.msra.mxu0 %v3989_v60 }
0x147a   :  { %3008 = vmatprep.subr.mxu0 %v3476_v0 }
0x147b   :  { %3009 = vmatpush3.msra.mxu0 %v3993_v61 }
0x147c   :  { %3010 = vmatprep.subr.mxu0 %v3476_v0 }
0x147d   :  { %3011 = vmatpush3.msra.mxu0 %v3997_v4  ;;  %v1850_v4 = vpop.permute.xlu1 %1849 }
0x147e   :  { %3012 = vmatprep.subr.mxu0 %v3476_v0 }
0x147f   :  { %3013 = vmatpush3.msra.mxu0 %v4056_v11  ;;  %v2053_v11 = vld [vmem:[#allocation15 + $0x48] sm:$0xff] }
0x1480   :  { %3014 = vmatprep.subr.mxu0 %v3476_v0  ;;  %3051 = vmatprep.subr.mxu1 %v2053_v11 }
0x1481   :  { %3015 = vmatpush3.msra.mxu0 %v4060_v12  ;;  %v2052_v12 = vld [vmem:[#allocation15 + $0x40] sm:$0xff]  ;;  %3052 = vmatpush3.msra.mxu1 %v2053_v11 }
0x1482   :  { %3017 = vmatmul.mubr.f32.vlgmr.msra.gmra.mxu0 %v1669_v48  ;;  %3053 = vmatprep.subr.mxu1 %v2052_v12  ;;  %v2013_v48 = vadd.f32 %v3032_v23, %v2404_v22 }
0x1483   :  { %3054 = vmatpush3.msra.mxu1 %v2052_v12  ;;  %3083 = vmatprep.subr.mxu0 %v2195_v42 }
0x1484   :  { %3055 = vmatprep.subr.mxu1 %v2051_v13  ;;  %3084 = vmatpush3.msra.mxu0 %v2195_v42 }
0x1485   :  { %3056 = vmatpush3.msra.mxu1 %v2051_v13  ;;  %3085 = vmatprep.subr.mxu0 %v2194_v43 }
0x1486   :  { %3057 = vmatprep.subr.mxu1 %v2050_v14  ;;  %3086 = vmatpush3.msra.mxu0 %v2194_v43 }
0x1487   :  { %3058 = vmatpush3.msra.mxu1 %v2050_v14  ;;  %3087 = vmatprep.subr.mxu0 %v2193_v44 }
0x1488   :  { %3059 = vmatprep.subr.mxu1 %v2049_v16  ;;  %3088 = vmatpush3.msra.mxu0 %v2193_v44 }
0x1489   :  { %3060 = vmatpush3.msra.mxu1 %v2049_v16  ;;  %3089 = vmatprep.subr.mxu0 %v2192_v46 }
0x148a   :  { %3061 = vmatprep.subr.mxu1 %v2048_v17  ;;  %3090 = vmatpush3.msra.mxu0 %v2192_v46 }
0x148b   :  { %3062 = vmatpush3.msra.mxu1 %v2048_v17  ;;  %3091 = vmatprep.subr.mxu0 %v2191_v47 }
0x148c   :  { %3063 = vmatprep.subr.mxu1 %v2047_v18  ;;  %3092 = vmatpush3.msra.mxu0 %v2191_v47 }
0x148d   :  { %3064 = vmatpush3.msra.mxu1 %v2047_v18  ;;  %3093 = vmatprep.subr.mxu0 %v2190_v49 }
0x148e   :  { %3065 = vmatprep.subr.mxu1 %v2046_v19  ;;  %3094 = vmatpush3.msra.mxu0 %v2190_v49 }
0x148f   :  { %3066 = vmatpush3.msra.mxu1 %v2046_v19  ;;  %3095 = vmatprep.subr.mxu0 %v2189_v62 }
0x1490   :  { %3067 = vmatprep.subr.mxu1 %v2045_v20  ;;  %3096 = vmatpush3.msra.mxu0 %v2189_v62 }
0x1491   :  { %3068 = vmatpush3.msra.mxu1 %v2045_v20  ;;  %3097 = vmatprep.subr.mxu0 %v2188_v63 }
0x1492   :  { %3069 = vmatprep.subr.mxu1 %v2044_v38  ;;  %3098 = vmatpush3.msra.mxu0 %v2188_v63 }
0x1493   :  { %3070 = vmatpush3.msra.mxu1 %v2044_v38  ;;  %3099 = vmatprep.subr.mxu0 %v2187_v9 }
0x1494   :  { %3100 = vmatpush3.msra.mxu0 %v2187_v9 }
0x1495   :  { %3101 = vmatprep.subr.mxu0 %v2186_v15 }
0x1496   :  { %3102 = vmatpush3.msra.mxu0 %v2186_v15 }
0x1522   :  { %v1759_v50 = vpop.f32.mrf.mxu0 }
0x1524   :  { %v2983_v51 = vpop.f32.mrf.mxu0 }
0x1525   :  { %v2018_v51 = vadd.f32 %v2404_v22, %v2017_v32 }
0x1542   :  { %v1829_v52 = vpop.f32.mrf.mxu0 }
0x1543   :  { %v1830_v53 = vadd.f32 %v1829_v52, %v1759_v50  ;;  %v2038_v50 = vmax.f32 %v2008_v29, 0.0  ;;  %v2039_v52 = vmax.f32 %v2013_v48, 0.0 }
0x1544   :  { %v3018_v54 = vpop.f32.mrf.mxu0 }
0x1545   :  { %v1840_v55 = vadd.f32 %v4074_v45, %v1830_v53  ;;  %v2023_v53 = vadd.f32 %v3035_v25, %v2404_v22  ;;  %v2040_v54 = vmax.f32 %v2018_v51, 0.0 }
0x1547   :  { %3202 = vtanh.f32 %v1840_v55  ;;  %v2403_v57 = vmul.f32 -1.442695, %v1840_v55  ;;  %v2041_v55 = vmax.f32 %v2023_v53, 0.0 }
0x1549   :  { %3204 = vpow2.f32 %v2403_v57  ;;  %v2184_v57 = vld [vmem:[#allocation16 + $0x20] sm:$0xff] }
0x1554   :  { %v3203_v56 = vpop.eup %3202 }
0x1555   :  { %1854 = vrot.lane.b32.xlu0 %v3203_v56, %s3478_s24  ;;  %v2185_v56 = vld [vmem:[#allocation16 + $0x28] sm:$0xff] }
0x1556   :  { %v3205_v58 = vpop.eup %3204  ;;  %3103 = vmatprep.subr.mxu0 %v2185_v56 }
0x1557   :  { %v1844_v59 = vadd.f32 1.0, %v3205_v58  ;;  %3104 = vmatpush3.msra.mxu0 %v2185_v56  ;;  %v2183_v58 = vld [vmem:[#allocation16 + $0x18] sm:$0xff] }
0x1558   :  { %3105 = vmatprep.subr.mxu0 %v2184_v57 }
0x1559   :  { %3206 = vrcp.f32 %v1844_v59  ;;  %3106 = vmatpush3.msra.mxu0 %v2184_v57  ;;  %v2182_v59 = vld [vmem:[#allocation16 + $0x10] sm:$0xff] }
0x155a   :  { %3107 = vmatprep.subr.mxu0 %v2183_v58 }
0x155b   :  { %3108 = vmatpush3.msra.mxu0 %v2183_v58 }
0x155c   :  { %3109 = vmatprep.subr.mxu0 %v2182_v59 }
0x155d   :  { %3110 = vmatpush3.msra.mxu0 %v2182_v59 }
0x1566   :  { %v3207_v0 = vpop.eup %3206 }
0x1567   :  { %v1852_v33 = vmul.f32 %v3207_v0, %v1850_v4 }
0x15c7   :  { %v1855_v60 = vpop.permute.xlu0 %1854 }
0x15c8   :  { %v1857_v61 = vmul.f32 %v3207_v0, %v1855_v60  ;;  %v2180_v60 = vld [vmem:[#allocation16] sm:$0xff] }
0x15ca   :  { %1859 = vrot.lane.b32.xlu0 %v1857_v61, %s3479_s6 }
0x163c   :  { %v1860_v34 = vpop.permute.xlu0 %1859 }
0x163d   :  { %v1862_v35 = vadd.f32 %v1860_v34, %v1852_v33 }
0x163f   :  { %3208 = vtanh.f32 %v1862_v35 }
0x164c   :  { %v3209_v5 = vpop.eup %3208 }
0x164d   :  { %1865 = vrot.lane.b32.xlu1 %v3209_v5, %s3478_s24 }
0x1651   :  { %1875 = vrot.lane.b32.xlu1 %v1862_v35, %s3480_s25  ;;  %v2413_v35 = vld [vmem:[%s4179_s9] ss:$0 sm:$0xff] }
0x16bf   :  { %v1866_v39 = vpop.permute.xlu1 %1865 }
0x16c0   :  { %v1868_v40 = vmul.f32 %v3207_v0, %v1866_v39  ;;  %v2181_v0 = vld [vmem:[#allocation16 + $0x8] sm:$0xff] }
0x16c1   :  { %3111 = vmatprep.subr.mxu0 %v2181_v0 }
0x16c2   :  { %1870 = vrot.lane.b32.xlu0 %v1868_v40, %s3479_s6  ;;  %3112 = vmatpush3.msra.mxu0 %v2181_v0 }
0x16c3   :  { %v1876_v41 = vpop.permute.xlu1 %1875  ;;  %3113 = vmatprep.subr.mxu0 %v2180_v60 }
0x16c4   :  { %1878 = vst.msk [vmem:[#allocation3] sm:$0xff] %vm158_vm1, %v1876_v41  ;;  %3114 = vmatpush3.msra.mxu0 %v2180_v60 }
0x16cb   :  { %v1886_v45 = vld [vmem:[#allocation3] sm:$0xff] }
0x16cc   :  { %1887 = vst.msk [vmem:[#allocation21] sm:$0xff] %vm158_vm1, %v1886_v45  ;;  %v4142_v45 = vld [vmem:[%s4181_s11] ss:$0 sm:$0xff]  ;;  %s3481_s11 = smov [#allocation19]  }
0x16cd   :  { %s2334_s17 = sshll.u32 %s3481_s11, 4  ;;  %s2335_s17 = int_to_ptr.vmem [resolvable:$true] %s2334_s17 }
0x16ce   :  { %s3370_s2 = scalar_lea.vmem %s2335_s17, 128  ;;  %p3375_p13 = scmp.lt.s32.totalorder %s2335_s17, %s2335_s17 }
0x16cf   :  { %p3371_p12 = scmp.ne.s32.totalorder %s2335_s17, %s3370_s2  ;;  %p3376_p0 = scmp.lt.s32.totalorder %s3370_s2, %s3370_s2 }
0x16d1   :  { %p3377_p1 = por %p3376_p0, %p3375_p13 }
0x16d3   :  { %p3378_p2 = pnand %p3377_p1, %p3371_p12 }
0x1734   :  { %v1871_v21 = vpop.permute.xlu0 %1870 }
0x1735   :  { %1873 = vst.msk [vmem:[#allocation2] sm:$0xff] %vm158_vm1, %v1871_v21  ;;  %1880 = vst.msk [vmem:[#allocation18 + $0x38] sm:$0xff] %vm158_vm1, %v1871_v21 }
0x173c   :  { %v1895_v30 = vld [vmem:[#allocation18 + $0x38] sm:$0xff]  ;;  %v1884_v31 = vld [vmem:[#allocation2] sm:$0xff] }
0x173d   :  { %3037 = vmatmul.mubr.msk.f32.gmra.mxu1 %vm158_vm1, %v1895_v30  ;;  %1885 = vst.msk [vmem:[#allocation19] sm:$0xff] %vm158_vm1, %v1884_v31 }
0x173e   :  { %3071 = vmatprep.mubr.f32.mxu1 %v2036_v27 }
0x1741   :  { %3072 = vmatmul.mubr.f32.vlgmr.msra.gmra.mxu1 %v2037_v28 }
0x1742   :  { %3074 = vmatprep.mubr.f32.mxu1 %v2038_v50 }
0x1745   :  { %3075 = vmatmul.mubr.f32.gmra.mxu1 %v2039_v52 }
0x1746   :  { %3077 = vmatprep.mubr.f32.mxu1 %v2040_v54 }
0x1749   :  { %3078 = vmatmul.mubr.f32.gmra.mxu1 %v2041_v55 }
0x17fd   :  { %v3038_v61 = vpop.f32.mrf.mxu1 }
0x17fe   :  { %v2033_v4 = vadd.f32 %v3038_v61, %v2404_v22 }
0x17ff   :  { %v2027_v33 = vpop.f32.mrf.mxu1 }
0x1800   :  { %v2028_v34 = vadd.f32 %v2404_v22, %v2027_v33  ;;  %v2043_v1 = vmax.f32 %v2033_v4, 0.0 }
0x1801   :  { %v3073_v36 = vpop.f32.mrf.mxu1 }
0x1802   :  { %v2042_v37 = vmax.f32 %v2028_v34, 0.0  ;;  %v2139_v2 = vadd.f32 %v3073_v36, %v2413_v35 }
0x1803   :  { %v2133_v3 = vpop.f32.mrf.mxu1 }
0x1804   :  { %v2134_v5 = vadd.f32 %v2413_v35, %v2133_v3  ;;  %3080 = vmatprep.mubr.f32.mxu1 %v2042_v37  ;;  %v2173_v12 = vmax.f32 %v2139_v2, 0.0 }
0x1805   :  { %v3076_v8 = vpop.f32.mrf.mxu1  ;;  %3081 = vmatmul.mubr.f32.gmra.mxu1 %v2043_v1 }
0x1806   :  { %v2172_v11 = vmax.f32 %v2134_v5, 0.0  ;;  %v2149_v13 = vadd.f32 %v3076_v8, %v2413_v35 }
0x1807   :  { %v2143_v14 = vpop.f32.mrf.mxu1 }
0x1808   :  { %v2144_v16 = vadd.f32 %v2413_v35, %v2143_v14  ;;  %3115 = vmatprep.mubr.f32.mxu0 %v2172_v11  ;;  %v2175_v19 = vmax.f32 %v2149_v13, 0.0 }
0x1809   :  { %v3079_v17 = vpop.f32.mrf.mxu1  ;;  %3116 = vmatmul.mubr.f32.vlgmr.msra.gmra.mxu0 %v2173_v12 }
0x180a   :  { %v2174_v18 = vmax.f32 %v2144_v16, 0.0  ;;  %v2159_v20 = vadd.f32 %v3079_v17, %v2413_v35 }
0x180b   :  { %v2153_v38 = vpop.f32.mrf.mxu1 }
0x180c   :  { %v2154_v39 = vadd.f32 %v2413_v35, %v2153_v38  ;;  %3118 = vmatprep.mubr.f32.mxu0 %v2174_v18  ;;  %v2177_v41 = vmax.f32 %v2159_v20, 0.0 }
0x180d   :  { %3119 = vmatmul.mubr.f32.gmra.mxu0 %v2175_v19 }
0x180e   :  { %v2176_v40 = vmax.f32 %v2154_v39, 0.0 }
0x1810   :  { %3121 = vmatprep.mubr.f32.mxu0 %v2176_v40 }
0x1811   :  { %3122 = vmatmul.mubr.f32.gmra.mxu0 %v2177_v41 }
0x18c5   :  { %v3082_v42 = vpop.f32.mrf.mxu1 }
0x18c6   :  { %v2169_v43 = vadd.f32 %v3082_v42, %v2413_v35 }
0x18c7   :  { %v2163_v44 = vpop.f32.mrf.mxu1 }
0x18c8   :  { %v2164_v46 = vadd.f32 %v2413_v35, %v2163_v44  ;;  %v2179_v63 = vmax.f32 %v2169_v43, 0.0 }
0x18c9   :  { %v3117_v47 = vpop.f32.mrf.mxu0 }
0x18ca   :  { %v2178_v49 = vmax.f32 %v2164_v46, 0.0  ;;  %v2275_v62 = vadd.f32 %v3117_v47, %v4142_v45 }
0x18cb   :  { %v2269_v9 = vpop.f32.mrf.mxu0 }
0x18cc   :  { %2309 = vst [vmem:[#allocation22 + $0x8] sm:$0xff] %v2275_v62  ;;  %v2270_v15 = vadd.f32 %v4142_v45, %v2269_v9  ;;  %3124 = vmatprep.mubr.f32.mxu0 %v2178_v49 }
0x18cd   :  { %v3120_v6 = vpop.f32.mrf.mxu0  ;;  %3125 = vmatmul.mubr.f32.gmra.mxu0 %v2179_v63 }
0x18ce   :  { %2308 = vst [vmem:[#allocation22] sm:$0xff] %v2270_v15  ;;  %v2285_v7 = vadd.f32 %v3120_v6, %v4142_v45 }
0x18cf   :  { %v2279_v23 = vpop.f32.mrf.mxu0 }
0x18d0   :  { %2311 = vst [vmem:[#allocation22 + $0x18] sm:$0xff] %v2285_v7  ;;  %v2280_v21 = vadd.f32 %v4142_v45, %v2279_v23 }
0x18d1   :  { %v3123_v24 = vpop.f32.mrf.mxu0 }
0x18d2   :  { %2310 = vst [vmem:[#allocation22 + $0x10] sm:$0xff] %v2280_v21  ;;  %v2295_v22 = vadd.f32 %v3123_v24, %v4142_v45 }
0x18d3   :  { %v2289_v10 = vpop.f32.mrf.mxu0 }
0x18d4   :  { %2313 = vst [vmem:[#allocation22 + $0x28] sm:$0xff] %v2295_v22  ;;  %v2290_v25 = vadd.f32 %v4142_v45, %v2289_v10 }
0x18d6   :  { %2312 = vst [vmem:[#allocation22 + $0x20] sm:$0xff] %v2290_v25 }
0x18d7   :  { %3381 = shalt.err (!%p3378_p2)
}
0x18d8   :  { %2337 = dma.vmem_to_hbm [thread:$0]  %s2335_s17, 128, %s4183_s13, [#allocation20]  }
0x18d9   :  { %s3390_s21 = scalar_lea.vmem %s2322_s18, 1024  ;;  %p3395_p4 = scmp.lt.s32.totalorder %s2322_s18, %s2322_s18 }
0x18da   :  { %p3391_p3 = scmp.ne.s32.totalorder %s2322_s18, %s3390_s21  ;;  %p3396_p5 = scmp.lt.s32.totalorder %s3390_s21, %s3390_s21 }
0x18dc   :  { %p3397_p6 = por %p3396_p5, %p3395_p4 }
0x18de   :  { %p3398_p7 = pnand %p3397_p6, %p3391_p3 }
0x18e0   :  { %3401 = shalt.err (!%p3398_p7)
}
0x18e1   :  { %2327 = dma.vmem_to_hbm [thread:$0]  %s2322_s18, 1024, %s4182_s12, [#allocation6], %s3469_s28, %s3469_s28, %s3470_s29  }
0x18e2   :  { %s3483_s4 = smov [#allocation21]  }
0x18e3   :  { %s2344_s23 = sshll.u32 %s3483_s4, 4  ;;  %s2345_s23 = int_to_ptr.vmem [resolvable:$true] %s2344_s23 }
0x18e4   :  { %s3410_s8 = scalar_lea.vmem %s2345_s23, 128  ;;  %p3415_p9 = scmp.lt.s32.totalorder %s2345_s23, %s2345_s23 }
0x18e5   :  { %p3411_p8 = scmp.ne.s32.totalorder %s2345_s23, %s3410_s8  ;;  %p3416_p10 = scmp.lt.s32.totalorder %s3410_s8, %s3410_s8 }
0x18e7   :  { %p3417_p11 = por %p3416_p10, %p3415_p9 }
0x18e9   :  { %p3418_p12 = pnand %p3417_p11, %p3411_p8 }
0x18eb   :  { %3421 = shalt.err (!%p3418_p12)
}
0x18ec   :  { %2347 = dma.vmem_to_hbm [thread:$0]  %s2345_s23, 128, %s4184_s14, [#allocation20]  }
0x18ed   :  { %s3484_s24 = smov [#allocation22]  }
0x18ee   :  { %s2353_s6 = sshll.u32 %s3484_s24, 4  ;;  %s2354_s6 = int_to_ptr.vmem [resolvable:$true] %s2353_s6 }
0x18ef   :  { %s3430_s12 = scalar_lea.vmem %s2354_s6, 1024  ;;  %p3435_p0 = scmp.lt.s32.totalorder %s2354_s6, %s2354_s6 }
0x18f0   :  { %p3431_p13 = scmp.ne.s32.totalorder %s2354_s6, %s3430_s12  ;;  %p3436_p1 = scmp.lt.s32.totalorder %s3430_s12, %s3430_s12 }
0x18f2   :  { %p3437_p2 = por %p3436_p1, %p3435_p0 }
0x18f4   :  { %p3438_p3 = pnand %p3437_p2, %p3431_p13 }
0x198d   :  { %v3126_v26 = vpop.f32.mrf.mxu0 }
0x198e   :  { %v2305_v27 = vadd.f32 %v3126_v26, %v4142_v45 }
0x198f   :  { %v2299_v29 = vpop.f32.mrf.mxu0 }
0x1990   :  { %2315 = vst [vmem:[#allocation22 + $0x38] sm:$0xff] %v2305_v27  ;;  %v2300_v30 = vadd.f32 %v4142_v45, %v2299_v29 }
0x1992   :  { %2314 = vst [vmem:[#allocation22 + $0x30] sm:$0xff] %v2300_v30 }
0x1993   :  { %3441 = shalt.err (!%p3438_p3)
}
0x1994   :  { %2359 = dma.vmem_to_hbm [thread:$0]  %s2354_s6, 1024, %s4185_s15, [#allocation23], %s3469_s28, %s3469_s28, %s3470_s29  }
0x1995   :  { %3460 = dma.done.wait [#allocation6], 1024  }
0x1996   :  { %3461 = vsyncadd [#allocation6], 4294966272 }
0x1997   :  { %3462 = dma.done.wait [#allocation20], 256  }
0x1998   :  { %3463 = vsyncadd [#allocation20], 4294967040 }
0x1999   :  { %3464 = dma.done.wait [#allocation23], 1024  }
0x199a   :  { %3465 = vsyncadd [#allocation23], 4294966272 }
0x199b   :  { %2372 = vsyncpa [#allocation5], 1 }
0x199c   :  { %2373 = vsyncpa [#allocation8], 1 }
0x199d   :  { %2374 = vsyncpa [#allocation11], 1 }
0x199e   :  { %2375 = vsyncpa [#allocation14], 1 }
0x199f   :  { %2376 = vsyncpa [#allocation17], 1 }
0x19a0   :  { %2377 = vsyncpa [#allocation6], 1 }
0x19a1   :  { %2378 = vsyncpa [#allocation20], 1 }
0x19a2   :  { %2379 = vsyncpa [#allocation23], 1 }

</bundles_post_ra>
